<compile_context>
chip_gen: v7x
topology: tpu7x:2x2x1
jax: 0.10.0
libtpu: 0.0.40
codegen_flags: <defaults>
</compile_context>

<pallas_src>
import jax
import jax.numpy as jnp
from jax import lax
from jax.experimental import pallas as pl
from jax.experimental.pallas import tpu as pltpu

_LANE = 128
_ROW_TILE_CAP = 512   # rows per grid step; 4*512*Kp bf16 stays well inside scoped VMEM


def _round_up(x, m):
    return ((x + m - 1) // m) * m


# ---------------------------------------------------------------------------
# Kernels
# ---------------------------------------------------------------------------
def conv_relu_pool_kernel(p_ref, w_ref, b_ref, o_ref):
    """Fused conv (im2col matmul) + bias + ReLU + 2x2/stride-2 max-pool.

    p_ref : (4, TM, Kp) bf16 patch block, one row-group per pool-window offset.
    w_ref : (Kp, Cp)    bf16 flattened conv weights ((kh, kw, cin) order), zero-padded.
    b_ref : (1, Cp)     f32 bias (zero-padded).
    o_ref : (TM, Cp)    f32 pooled activations (rows ordered (n, ph, pw)).
    """
    tm = o_ref.shape[0]
    kp = p_ref.shape[-1]
    # One tall matmul instead of four small ones (amortizes MXU ramp-up and RHS
    # weight pushes).  TM is a multiple of 16 and Kp of 128 -> layout-free merge.
    pm = p_ref[...].reshape(4 * tm, kp)
    y = jnp.dot(pm, w_ref[...], preferred_element_type=jnp.float32)      # (4*TM, Cp) f32
    # 2x2 max-pool == max over the four pool-offset row groups (8-aligned slices).
    m = jnp.maximum(jnp.maximum(y[0:tm], y[tm:2 * tm]),
                    jnp.maximum(y[2 * tm:3 * tm], y[3 * tm:4 * tm]))
    # Bias is identical across offsets and ReLU commutes with max -> apply once.
    o_ref[...] = jnp.maximum(m + b_ref[...], 0.0)


def mlp_kernel(x_ref, w1_ref, b1_ref, w2_ref, b2_ref, w3_ref, b3_ref, o_ref):
    """fc1 -> ReLU -> fc2 -> ReLU -> fc3, fused; bf16 MXU operands, f32 accumulation."""
    h = jnp.dot(x_ref[...], w1_ref[...], preferred_element_type=jnp.float32) + b1_ref[...]
    h = jnp.maximum(h, 0.0).astype(jnp.bfloat16)
    h = jnp.dot(h, w2_ref[...], preferred_element_type=jnp.float32) + b2_ref[...]
    h = jnp.maximum(h, 0.0).astype(jnp.bfloat16)
    o_ref[...] = jnp.dot(h, w3_ref[...], preferred_element_type=jnp.float32) + b3_ref[...]


# ---------------------------------------------------------------------------
# Wrappers (plain-JAX glue: layout / strided-slice patch extraction / padding)
# ---------------------------------------------------------------------------
def conv_relu_pool(x_nhwc, w, b, KH=5, KW=5):
    """x: (N, H, W, Cin) f32 NHWC; w: (KH, KW, Cin, Cout); b: (Cout,)."""
    N, H, W, C = x_nhwc.shape
    Cout = w.shape[-1]
    OH, OW = H - KH + 1, W - KW + 1          # 'valid' conv, stride 1
    PH, PW = OH // 2, OW // 2                # 2x2 max-pool, stride 2
    K = KH * KW * C
    Kp = _round_up(K, _LANE)
    Cp = _round_up(Cout, _LANE)
    M = N * PH * PW
    TM = min(_ROW_TILE_CAP, _round_up(M, 16))
    Mp = _round_up(M, TM)

    # Build the 4 pool-offset patch matrices directly from strided slices of x
    # (no full im2col intermediate + re-gather round trip through HBM).
    offs = []
    for jh in range(2):
        for jw in range(2):
            cols = []
            for kh in range(KH):
                for kw in range(KW):
                    cols.append(lax.slice(
                        x_nhwc,
                        (0, jh + kh, jw + kw, 0),
                        (N, jh + kh + 2 * (PH - 1) + 1, jw + kw + 2 * (PW - 1) + 1, C),
                        (1, 2, 2, 1)))                      # (N, PH, PW, C)
            offs.append(jnp.concatenate(cols, axis=-1).reshape(M, K))
    p = jnp.stack(offs, axis=0)                              # (4, M, K)
    p = jnp.pad(p, ((0, 0), (0, Mp - M), (0, Kp - K))).astype(jnp.bfloat16)

    wf = jnp.pad(w.reshape(K, Cout), ((0, Kp - K), (0, Cp - Cout))).astype(jnp.bfloat16)
    bf = jnp.pad(b.reshape(1, Cout).astype(jnp.float32), ((0, 0), (0, Cp - Cout)))

    out = pl.pallas_call(
        conv_relu_pool_kernel,
        grid=(Mp // TM,),
        in_specs=[
            pl.BlockSpec((4, TM, Kp), lambda i: (0, i, 0)),
            pl.BlockSpec((Kp, Cp), lambda i: (0, 0)),
            pl.BlockSpec((1, Cp), lambda i: (0, 0)),
        ],
        out_specs=pl.BlockSpec((TM, Cp), lambda i: (i, 0)),
        out_shape=jax.ShapeDtypeStruct((Mp, Cp), jnp.float32),
        compiler_params=pltpu.CompilerParams(dimension_semantics=("parallel",)),
    )(p, wf, bf)
    return out[:M, :Cout].reshape(N, PH, PW, Cout)


def mlp(x, fc_params):
    (w1, b1), (w2, b2), (w3, b3) = fc_params
    N, K = x.shape
    out_dim = w3.shape[1]
    Kp = _round_up(K, _LANE)
    H1p = _round_up(w1.shape[1], _LANE)
    H2p = _round_up(w2.shape[1], _LANE)
    Op = _round_up(out_dim, _LANE)
    TN = min(256, _round_up(N, 16))
    Np = _round_up(N, TN)

    xp = jnp.pad(x, ((0, Np - N), (0, Kp - K))).astype(jnp.bfloat16)
    w1p = jnp.pad(w1, ((0, Kp - K), (0, H1p - w1.shape[1]))).astype(jnp.bfloat16)
    b1p = jnp.pad(b1, ((0, 0), (0, H1p - b1.shape[1])))
    w2p = jnp.pad(w2, ((0, H1p - w2.shape[0]), (0, H2p - w2.shape[1]))).astype(jnp.bfloat16)
    b2p = jnp.pad(b2, ((0, 0), (0, H2p - b2.shape[1])))
    w3p = jnp.pad(w3, ((0, H2p - w3.shape[0]), (0, Op - w3.shape[1]))).astype(jnp.bfloat16)
    b3p = jnp.pad(b3, ((0, 0), (0, Op - b3.shape[1])))

    out = pl.pallas_call(
        mlp_kernel,
        grid=(Np // TN,),
        in_specs=[
            pl.BlockSpec((TN, Kp), lambda i: (i, 0)),
            pl.BlockSpec((Kp, H1p), lambda i: (0, 0)),
            pl.BlockSpec((1, H1p), lambda i: (0, 0)),
            pl.BlockSpec((H1p, H2p), lambda i: (0, 0)),
            pl.BlockSpec((1, H2p), lambda i: (0, 0)),
            pl.BlockSpec((H2p, Op), lambda i: (0, 0)),
            pl.BlockSpec((1, Op), lambda i: (0, 0)),
        ],
        out_specs=pl.BlockSpec((TN, Op), lambda i: (i, 0)),
        out_shape=jax.ShapeDtypeStruct((Np, Op), jnp.float32),
        compiler_params=pltpu.CompilerParams(dimension_semantics=("parallel",)),
    )(xp, w1p, b1p, w2p, b2p, w3p, b3p)
    return out[:N, :out_dim]


# ---------------------------------------------------------------------------
# Parameter init (deterministic, PyTorch-like U(-1/sqrt(fan_in), 1/sqrt(fan_in)))
#
# Layouts (vs. PyTorch):
#   conv weights: (KH, KW, Cin, Cout)    [PyTorch: (Cout, Cin, KH, KW)]
#   fc weights:   (in, out)              [PyTorch: (out, in)]
# fc1's input dim is ordered (C, H, W) exactly like the reference `x.view(-1, 400)`.
# ---------------------------------------------------------------------------
def init_params(key):
    def uinit(k, shape, fan_in):
        bound = 1.0 / float(fan_in) ** 0.5
        return jax.random.uniform(k, shape, jnp.float32, -bound, bound)

    ks = jax.random.split(key, 10)
    conv1 = (uinit(ks[0], (5, 5, 3, 6), 5 * 5 * 3), uinit(ks[1], (6,), 5 * 5 * 3))
    conv2 = (uinit(ks[2], (5, 5, 6, 16), 5 * 5 * 6), uinit(ks[3], (16,), 5 * 5 * 6))
    fcs = (
        (uinit(ks[4], (16 * 5 * 5, 120), 400), uinit(ks[5], (1, 120), 400)),
        (uinit(ks[6], (120, 84), 120), uinit(ks[7], (1, 84), 120)),
        (uinit(ks[8], (84, 10), 84), uinit(ks[9], (1, 10), 84)),
    )
    return conv1, conv2, fcs


# ---------------------------------------------------------------------------
# Forward pass
# ---------------------------------------------------------------------------
@jax.jit
def net_forward(x_nchw, params):
    conv1, conv2, fcs = params
    x = jnp.transpose(x_nchw, (0, 2, 3, 1))      # NCHW -> NHWC (layout glue)
    x = conv_relu_pool(x, *conv1)                # (N, 14, 14, 6)
    x = conv_relu_pool(x, *conv2)                # (N, 5, 5, 16)
    n = x.shape[0]
    # Match PyTorch's x.view(-1, 16*5*5): flatten in (C, H, W) order.
    x = jnp.transpose(x, (0, 3, 1, 2)).reshape(n, 16 * 5 * 5)
    return mlp(x, fcs)                           # (N, 10)


if __name__ == "__main__":
    key = jax.random.PRNGKey(0)
    pkey, xkey = jax.random.split(key)
    params = init_params(pkey)
    # PyTorch-convention NCHW input; 32x32x3 is required by the 16*5*5 flatten.
    x = jax.random.normal(xkey, (2, 3, 32, 32), jnp.float32)
    out = net_forward(x, params)
    out = jax.block_until_ready(out)
    assert out.shape == (2, 10) and out.dtype == jnp.float32
    assert bool(jnp.all(jnp.isfinite(out)))
    print("KERNEL_OK")
</pallas_src>

<mosaic_0001>
module attributes {stable_mosaic.version = 11 : i64} {
  func.func @conv_relu_pool_kernel(%arg0: i32, %arg1: memref<4x400x128xbf16, #tpu.memory_space<vmem>>, %arg2: memref<128x128xbf16, #tpu.memory_space<vmem>>, %arg3: memref<1x128xf32, #tpu.memory_space<vmem>>, %arg4: memref<400x128xf32, #tpu.memory_space<vmem>>) attributes {dimension_semantics = [#tpu.dimension_semantics<parallel>], iteration_bounds = array<i64: 1>, scalar_prefetch = 0 : i64, scratch_operands = 0 : i64, tpu.core_type = #tpu.core_type<tc>, window_params = [{transform_indices = @transform_0, window_bounds = array<i64: 4, 400, 128>}, {pipeline_mode = #tpu.pipeline_mode<synchronous>, transform_indices = @transform_1, window_bounds = array<i64: 128, 128>}, {pipeline_mode = #tpu.pipeline_mode<synchronous>, transform_indices = @transform_2, window_bounds = array<i64: 1, 128>}, {transform_indices = @transform_3, window_bounds = array<i64: 400, 128>}]} {
    %c0 = arith.constant 0 : index
    %c0_0 = arith.constant 0 : index
    %c0_1 = arith.constant 0 : index
    %0 = vector.load %arg1[%c0, %c0_0, %c0_1] : memref<4x400x128xbf16, #tpu.memory_space<vmem>>, vector<4x400x128xbf16>
    %1 = vector.shape_cast %0 : vector<4x400x128xbf16> to vector<1600x128xbf16>
    %c0_2 = arith.constant 0 : index
    %c0_3 = arith.constant 0 : index
    %2 = vector.load %arg2[%c0_2, %c0_3] : memref<128x128xbf16, #tpu.memory_space<vmem>>, vector<128x128xbf16>
    %cst = arith.constant dense<0.000000e+00> : vector<1600x128xf32>
    %3 = tpu.matmul %1, %2, %cst {dimension_numbers = #tpu.dot_dimension_numbers<[1], [0], [0], [1], [0, 0, 1, 1], [], []>} : vector<1600x128xbf16>, vector<128x128xbf16>, vector<1600x128xf32> -> vector<1600x128xf32>
    %4 = vector.extract_strided_slice %3 {offsets = [0, 0], sizes = [400, 128], strides = [1, 1]} : vector<1600x128xf32> to vector<400x128xf32>
    %5 = vector.extract_strided_slice %3 {offsets = [400, 0], sizes = [400, 128], strides = [1, 1]} : vector<1600x128xf32> to vector<400x128xf32>
    %6 = arith.maximumf %4, %5 : vector<400x128xf32>
    %7 = vector.extract_strided_slice %3 {offsets = [800, 0], sizes = [400, 128], strides = [1, 1]} : vector<1600x128xf32> to vector<400x128xf32>
    %8 = vector.extract_strided_slice %3 {offsets = [1200, 0], sizes = [400, 128], strides = [1, 1]} : vector<1600x128xf32> to vector<400x128xf32>
    %9 = arith.maximumf %7, %8 : vector<400x128xf32>
    %10 = arith.maximumf %6, %9 : vector<400x128xf32>
    %c0_4 = arith.constant 0 : index
    %c0_5 = arith.constant 0 : index
    %11 = vector.load %arg3[%c0_4, %c0_5] : memref<1x128xf32, #tpu.memory_space<vmem>>, vector<1x128xf32>
    %12 = vector.broadcast %11 : vector<1x128xf32> to vector<400x128xf32>
    %13 = arith.addf %10, %12 : vector<400x128xf32>
    %cst_6 = arith.constant 0.000000e+00 : f32
    %14 = vector.broadcast %cst_6 : f32 to vector<400x128xf32>
    %15 = arith.maximumf %13, %14 : vector<400x128xf32>
    %c0_7 = arith.constant 0 : index
    %c0_8 = arith.constant 0 : index
    %16 = vector.load %arg4[%c0_7, %c0_8] : memref<400x128xf32, #tpu.memory_space<vmem>>, vector<400x128xf32>
    tpu.vector_store %arg4[%c0_7, %c0_8], %15 {strides = array<i32>} : memref<400x128xf32, #tpu.memory_space<vmem>>, vector<400x128xf32>,
    return
  }
  func.func @transform_0(%arg0: i32) -> (i32, i32, i32) {
    %c0_i32 = arith.constant 0 : i32
    %c0_i32_0 = arith.constant 0 : i32
    %c0_i32_1 = arith.constant 0 : i32
    return %c0_i32, %arg0, %c0_i32_0 : i32, i32, i32
  }
  func.func @transform_1(%arg0: i32) -> (i32, i32) {
    %c0_i32 = arith.constant 0 : i32
    %c0_i32_0 = arith.constant 0 : i32
    %c0_i32_1 = arith.constant 0 : i32
    return %c0_i32, %c0_i32_0 : i32, i32
  }
  func.func @transform_2(%arg0: i32) -> (i32, i32) {
    %c0_i32 = arith.constant 0 : i32
    %c0_i32_0 = arith.constant 0 : i32
    %c0_i32_1 = arith.constant 0 : i32
    return %c0_i32, %c0_i32_0 : i32, i32
  }
  func.func @transform_3(%arg0: i32) -> (i32, i32) {
    %c0_i32 = arith.constant 0 : i32
    %c0_i32_0 = arith.constant 0 : i32
    return %arg0, %c0_i32 : i32, i32
  }
}

module attributes {stable_mosaic.version = 11 : i64} {
  func.func @conv_relu_pool_kernel(%arg0: i32, %arg1: memref<4x64x256xbf16, #tpu.memory_space<vmem>>, %arg2: memref<256x128xbf16, #tpu.memory_space<vmem>>, %arg3: memref<1x128xf32, #tpu.memory_space<vmem>>, %arg4: memref<64x128xf32, #tpu.memory_space<vmem>>) attributes {dimension_semantics = [#tpu.dimension_semantics<parallel>], iteration_bounds = array<i64: 1>, scalar_prefetch = 0 : i64, scratch_operands = 0 : i64, tpu.core_type = #tpu.core_type<tc>, window_params = [{transform_indices = @transform_0, window_bounds = array<i64: 4, 64, 256>}, {pipeline_mode = #tpu.pipeline_mode<synchronous>, transform_indices = @transform_1, window_bounds = array<i64: 256, 128>}, {pipeline_mode = #tpu.pipeline_mode<synchronous>, transform_indices = @transform_2, window_bounds = array<i64: 1, 128>}, {transform_indices = @transform_3, window_bounds = array<i64: 64, 128>}]} {
    %c0 = arith.constant 0 : index
    %c0_0 = arith.constant 0 : index
    %c0_1 = arith.constant 0 : index
    %0 = vector.load %arg1[%c0, %c0_0, %c0_1] : memref<4x64x256xbf16, #tpu.memory_space<vmem>>, vector<4x64x256xbf16>
    %1 = vector.shape_cast %0 : vector<4x64x256xbf16> to vector<256x256xbf16>
    %c0_2 = arith.constant 0 : index
    %c0_3 = arith.constant 0 : index
    %2 = vector.load %arg2[%c0_2, %c0_3] : memref<256x128xbf16, #tpu.memory_space<vmem>>, vector<256x128xbf16>
    %cst = arith.constant dense<0.000000e+00> : vector<256x128xf32>
    %3 = tpu.matmul %1, %2, %cst {dimension_numbers = #tpu.dot_dimension_numbers<[1], [0], [0], [1], [0, 0, 1, 1], [], []>} : vector<256x256xbf16>, vector<256x128xbf16>, vector<256x128xf32> -> vector<256x128xf32>
    %4 = vector.extract_strided_slice %3 {offsets = [0, 0], sizes = [64, 128], strides = [1, 1]} : vector<256x128xf32> to vector<64x128xf32>
    %5 = vector.extract_strided_slice %3 {offsets = [64, 0], sizes = [64, 128], strides = [1, 1]} : vector<256x128xf32> to vector<64x128xf32>
    %6 = arith.maximumf %4, %5 : vector<64x128xf32>
    %7 = vector.extract_strided_slice %3 {offsets = [128, 0], sizes = [64, 128], strides = [1, 1]} : vector<256x128xf32> to vector<64x128xf32>
    %8 = vector.extract_strided_slice %3 {offsets = [192, 0], sizes = [64, 128], strides = [1, 1]} : vector<256x128xf32> to vector<64x128xf32>
    %9 = arith.maximumf %7, %8 : vector<64x128xf32>
    %10 = arith.maximumf %6, %9 : vector<64x128xf32>
    %c0_4 = arith.constant 0 : index
    %c0_5 = arith.constant 0 : index
    %11 = vector.load %arg3[%c0_4, %c0_5] : memref<1x128xf32, #tpu.memory_space<vmem>>, vector<1x128xf32>
    %12 = vector.broadcast %11 : vector<1x128xf32> to vector<64x128xf32>
    %13 = arith.addf %10, %12 : vector<64x128xf32>
    %cst_6 = arith.constant 0.000000e+00 : f32
    %14 = vector.broadcast %cst_6 : f32 to vector<64x128xf32>
    %15 = arith.maximumf %13, %14 : vector<64x128xf32>
    %c0_7 = arith.constant 0 : index
    %c0_8 = arith.constant 0 : index
    %16 = vector.load %arg4[%c0_7, %c0_8] : memref<64x128xf32, #tpu.memory_space<vmem>>, vector<64x128xf32>
    tpu.vector_store %arg4[%c0_7, %c0_8], %15 {strides = array<i32>} : memref<64x128xf32, #tpu.memory_space<vmem>>, vector<64x128xf32>,
    return
  }
  func.func @transform_0(%arg0: i32) -> (i32, i32, i32) {
    %c0_i32 = arith.constant 0 : i32
    %c0_i32_0 = arith.constant 0 : i32
    %c0_i32_1 = arith.constant 0 : i32
    return %c0_i32, %arg0, %c0_i32_0 : i32, i32, i32
  }
  func.func @transform_1(%arg0: i32) -> (i32, i32) {
    %c0_i32 = arith.constant 0 : i32
    %c0_i32_0 = arith.constant 0 : i32
    %c0_i32_1 = arith.constant 0 : i32
    return %c0_i32, %c0_i32_0 : i32, i32
  }
  func.func @transform_2(%arg0: i32) -> (i32, i32) {
    %c0_i32 = arith.constant 0 : i32
    %c0_i32_0 = arith.constant 0 : i32
    %c0_i32_1 = arith.constant 0 : i32
    return %c0_i32, %c0_i32_0 : i32, i32
  }
  func.func @transform_3(%arg0: i32) -> (i32, i32) {
    %c0_i32 = arith.constant 0 : i32
    %c0_i32_0 = arith.constant 0 : i32
    return %arg0, %c0_i32 : i32, i32
  }
}

module attributes {stable_mosaic.version = 11 : i64} {
  func.func @mlp_kernel(%arg0: i32, %arg1: memref<16x512xbf16, #tpu.memory_space<vmem>>, %arg2: memref<512x128xbf16, #tpu.memory_space<vmem>>, %arg3: memref<1x128xf32, #tpu.memory_space<vmem>>, %arg4: memref<128x128xbf16, #tpu.memory_space<vmem>>, %arg5: memref<1x128xf32, #tpu.memory_space<vmem>>, %arg6: memref<128x128xbf16, #tpu.memory_space<vmem>>, %arg7: memref<1x128xf32, #tpu.memory_space<vmem>>, %arg8: memref<16x128xf32, #tpu.memory_space<vmem>>) attributes {dimension_semantics = [#tpu.dimension_semantics<parallel>], iteration_bounds = array<i64: 1>, scalar_prefetch = 0 : i64, scratch_operands = 0 : i64, tpu.core_type = #tpu.core_type<tc>, window_params = [{transform_indices = @transform_0, window_bounds = array<i64: 16, 512>}, {pipeline_mode = #tpu.pipeline_mode<synchronous>, transform_indices = @transform_1, window_bounds = array<i64: 512, 128>}, {pipeline_mode = #tpu.pipeline_mode<synchronous>, transform_indices = @transform_2, window_bounds = array<i64: 1, 128>}, {pipeline_mode = #tpu.pipeline_mode<synchronous>, transform_indices = @transform_3, window_bounds = array<i64: 128, 128>}, {pipeline_mode = #tpu.pipeline_mode<synchronous>, transform_indices = @transform_4, window_bounds = array<i64: 1, 128>}, {pipeline_mode = #tpu.pipeline_mode<synchronous>, transform_indices = @transform_5, window_bounds = array<i64: 128, 128>}, {pipeline_mode = #tpu.pipeline_mode<synchronous>, transform_indices = @transform_6, window_bounds = array<i64: 1, 128>}, {transform_indices = @transform_7, window_bounds = array<i64: 16, 128>}]} {
    %c0 = arith.constant 0 : index
    %c0_0 = arith.constant 0 : index
    %0 = vector.load %arg1[%c0, %c0_0] : memref<16x512xbf16, #tpu.memory_space<vmem>>, vector<16x512xbf16>
    %c0_1 = arith.constant 0 : index
    %c0_2 = arith.constant 0 : index
    %1 = vector.load %arg2[%c0_1, %c0_2] : memref<512x128xbf16, #tpu.memory_space<vmem>>, vector<512x128xbf16>
    %cst = arith.constant dense<0.000000e+00> : vector<16x128xf32>
    %2 = tpu.matmul %0, %1, %cst {dimension_numbers = #tpu.dot_dimension_numbers<[1], [0], [0], [1], [0, 0, 1, 1], [], []>} : vector<16x512xbf16>, vector<512x128xbf16>, vector<16x128xf32> -> vector<16x128xf32>
    %c0_3 = arith.constant 0 : index
    %c0_4 = arith.constant 0 : index
    %3 = vector.load %arg3[%c0_3, %c0_4] : memref<1x128xf32, #tpu.memory_space<vmem>>, vector<1x128xf32>
    %4 = vector.broadcast %3 : vector<1x128xf32> to vector<16x128xf32>
    %5 = arith.addf %2, %4 : vector<16x128xf32>
    %cst_5 = arith.constant 0.000000e+00 : f32
    %6 = vector.broadcast %cst_5 : f32 to vector<16x128xf32>
    %7 = arith.maximumf %5, %6 : vector<16x128xf32>
    %8 = arith.truncf %7 : vector<16x128xf32> to vector<16x128xbf16>
    %c0_6 = arith.constant 0 : index
    %c0_7 = arith.constant 0 : index
    %9 = vector.load %arg4[%c0_6, %c0_7] : memref<128x128xbf16, #tpu.memory_space<vmem>>, vector<128x128xbf16>
    %cst_8 = arith.constant dense<0.000000e+00> : vector<16x128xf32>
    %10 = tpu.matmul %8, %9, %cst_8 {dimension_numbers = #tpu.dot_dimension_numbers<[1], [0], [0], [1], [0, 0, 1, 1], [], []>} : vector<16x128xbf16>, vector<128x128xbf16>, vector<16x128xf32> -> vector<16x128xf32>
    %c0_9 = arith.constant 0 : index
    %c0_10 = arith.constant 0 : index
    %11 = vector.load %arg5[%c0_9, %c0_10] : memref<1x128xf32, #tpu.memory_space<vmem>>, vector<1x128xf32>
    %12 = vector.broadcast %11 : vector<1x128xf32> to vector<16x128xf32>
    %13 = arith.addf %10, %12 : vector<16x128xf32>
    %cst_11 = arith.constant 0.000000e+00 : f32
    %14 = vector.broadcast %cst_11 : f32 to vector<16x128xf32>
    %15 = arith.maximumf %13, %14 : vector<16x128xf32>
    %16 = arith.truncf %15 : vector<16x128xf32> to vector<16x128xbf16>
    %c0_12 = arith.constant 0 : index
    %c0_13 = arith.constant 0 : index
    %17 = vector.load %arg6[%c0_12, %c0_13] : memref<128x128xbf16, #tpu.memory_space<vmem>>, vector<128x128xbf16>
    %cst_14 = arith.constant dense<0.000000e+00> : vector<16x128xf32>
    %18 = tpu.matmul %16, %17, %cst_14 {dimension_numbers = #tpu.dot_dimension_numbers<[1], [0], [0], [1], [0, 0, 1, 1], [], []>} : vector<16x128xbf16>, vector<128x128xbf16>, vector<16x128xf32> -> vector<16x128xf32>
    %c0_15 = arith.constant 0 : index
    %c0_16 = arith.constant 0 : index
    %19 = vector.load %arg7[%c0_15, %c0_16] : memref<1x128xf32, #tpu.memory_space<vmem>>, vector<1x128xf32>
    %20 = vector.broadcast %19 : vector<1x128xf32> to vector<16x128xf32>
    %21 = arith.addf %18, %20 : vector<16x128xf32>
    %c0_17 = arith.constant 0 : index
    %c0_18 = arith.constant 0 : index
    %22 = vector.load %arg8[%c0_17, %c0_18] : memref<16x128xf32, #tpu.memory_space<vmem>>, vector<16x128xf32>
    tpu.vector_store %arg8[%c0_17, %c0_18], %21 {strides = array<i32>} : memref<16x128xf32, #tpu.memory_space<vmem>>, vector<16x128xf32>,
    return
  }
  func.func @transform_0(%arg0: i32) -> (i32, i32) {
    %c0_i32 = arith.constant 0 : i32
    %c0_i32_0 = arith.constant 0 : i32
    return %arg0, %c0_i32 : i32, i32
  }
  func.func @transform_1(%arg0: i32) -> (i32, i32) {
    %c0_i32 = arith.constant 0 : i32
    %c0_i32_0 = arith.constant 0 : i32
    %c0_i32_1 = arith.constant 0 : i32
    return %c0_i32, %c0_i32_0 : i32, i32
  }
  func.func @transform_2(%arg0: i32) -> (i32, i32) {
    %c0_i32 = arith.constant 0 : i32
    %c0_i32_0 = arith.constant 0 : i32
    %c0_i32_1 = arith.constant 0 : i32
    return %c0_i32, %c0_i32_0 : i32, i32
  }
  func.func @transform_3(%arg0: i32) -> (i32, i32) {
    %c0_i32 = arith.constant 0 : i32
    %c0_i32_0 = arith.constant 0 : i32
    %c0_i32_1 = arith.constant 0 : i32
    return %c0_i32, %c0_i32_0 : i32, i32
  }
  func.func @transform_4(%arg0: i32) -> (i32, i32) {
    %c0_i32 = arith.constant 0 : i32
    %c0_i32_0 = arith.constant 0 : i32
    %c0_i32_1 = arith.constant 0 : i32
    return %c0_i32, %c0_i32_0 : i32, i32
  }
  func.func @transform_5(%arg0: i32) -> (i32, i32) {
    %c0_i32 = arith.constant 0 : i32
    %c0_i32_0 = arith.constant 0 : i32
    %c0_i32_1 = arith.constant 0 : i32
    return %c0_i32, %c0_i32_0 : i32, i32
  }
  func.func @transform_6(%arg0: i32) -> (i32, i32) {
    %c0_i32 = arith.constant 0 : i32
    %c0_i32_0 = arith.constant 0 : i32
    %c0_i32_1 = arith.constant 0 : i32
    return %c0_i32, %c0_i32_0 : i32, i32
  }
  func.func @transform_7(%arg0: i32) -> (i32, i32) {
    %c0_i32 = arith.constant 0 : i32
    %c0_i32_0 = arith.constant 0 : i32
    return %arg0, %c0_i32 : i32, i32
  }
}

</mosaic_0001>

<bundles_post_ra>
// kernel: net_forward.3
= control target key start
LH: loop header
LB: loop body
LE: loop exit
PB: predicated region body
PF: predicated region fallthrough
CT: control target
= control target key end

     0   :  { %s3429_s1 = inlined_call_operand.vmem [shape: bf16[128,128], index: 1, kind: input, shape index: {}]   ;;  %s3430_s0 = inlined_call_operand.vmem [shape: bf16[4,400,128], index: 0, kind: input, shape index: {}]   ;;  %s3431_s2 = inlined_call_operand.vmem [shape: f32[1,128], index: 2, kind: input, shape index: {}]   ;;  %s3432_s3 = inlined_call_operand.vmem [shape: f32[400,128], index: 3, kind: output, shape index: {}]  }
   0x1   :  { %v2472_v0 = vld [vmem:[%s3429_s1] sm:$0xff]   ;;  %v2473_v1 = vld [vmem:[%s3429_s1 + $0x8] sm:$0xff]   ;;  %v2474_v2 = vld [vmem:[%s3429_s1 + $0x10] sm:$0xff]  }
   0x2   :  { %2240 = vmatprep.subr.bf16.mxu0 %v2472_v0  ;;  %2456 = vmatprep.subr.bf16.mxu1 %v2472_v0  ;;  %v2475_v3 = vld [vmem:[%s3429_s1 + $0x18] sm:$0xff]   ;;  %v2480_v4 = vld [vmem:[%s3430_s0] sm:$0xff]   ;;  %v2481_v5 = vld [vmem:[%s3430_s0 + $0x190] sm:$0xff]  }
   0x3   :  { %2241 = vmatpush3.bf16.msra.mxu0 %v2472_v0  ;;  %2464 = vmatpush3.bf16.msra.mxu1 %v2472_v0  ;;  %v2476_v6 = vld [vmem:[%s3429_s1 + $0x20] sm:$0xff]   ;;  %v2477_v7 = vld [vmem:[%s3429_s1 + $0x28] sm:$0xff]   ;;  %v2478_v8 = vld [vmem:[%s3429_s1 + $0x30] sm:$0xff]  }
   0x4   :  { %2242 = vmatprep.subr.bf16.mxu0 %v2473_v1  ;;  %2457 = vmatprep.subr.bf16.mxu1 %v2473_v1  ;;  %v2479_v9 = vld [vmem:[%s3429_s1 + $0x38] sm:$0xff]   ;;  %v2482_v10 = vld [vmem:[%s3430_s0 + $0x8] sm:$0xff]   ;;  %v2484_v12 = vld [vmem:[%s3430_s0 + $0x10] sm:$0xff]  }
   0x5   :  { %2256 = vmatprep.mubr.bf16.mxu0 %v2480_v4  ;;  %2356 = vmatprep.mubr.bf16.mxu1 %v2481_v5  ;;  %v2483_v11 = vld [vmem:[%s3430_s0 + $0x198] sm:$0xff]   ;;  %v2485_v13 = vld [vmem:[%s3430_s0 + $0x1a0] sm:$0xff]   ;;  %v2487_v15 = vld [vmem:[%s3430_s0 + $0x1a8] sm:$0xff]  }
   0x6   :  { %v2486_v14 = vld [vmem:[%s3430_s0 + $0x18] sm:$0xff]   ;;  %v2488_v16 = vld [vmem:[%s3430_s0 + $0x20] sm:$0xff]   ;;  %v2489_v17 = vld [vmem:[%s3430_s0 + $0x1b0] sm:$0xff]  }
   0x7   :  { %2243 = vmatpush3.bf16.msra.mxu0 %v2473_v1  ;;  %2465 = vmatpush3.bf16.msra.mxu1 %v2473_v1  ;;  %v2490_v18 = vld [vmem:[%s3430_s0 + $0x28] sm:$0xff]   ;;  %v2491_v19 = vld [vmem:[%s3430_s0 + $0x1b8] sm:$0xff]   ;;  %v2492_v20 = vld [vmem:[%s3430_s0 + $0x30] sm:$0xff]  }
   0x8   :  { %2244 = vmatprep.subr.bf16.mxu0 %v2474_v2  ;;  %2458 = vmatprep.subr.bf16.mxu1 %v2474_v2  ;;  %v2493_v21 = vld [vmem:[%s3430_s0 + $0x1c0] sm:$0xff]   ;;  %v2494_v22 = vld [vmem:[%s3430_s0 + $0x38] sm:$0xff]   ;;  %v2495_v23 = vld [vmem:[%s3430_s0 + $0x1c8] sm:$0xff]  }
   0x9   :  { %v2496_v24 = vld [vmem:[%s3430_s0 + $0x40] sm:$0xff]   ;;  %v2497_v25 = vld [vmem:[%s3430_s0 + $0x1d0] sm:$0xff]   ;;  %v2498_v26 = vld [vmem:[%s3430_s0 + $0x48] sm:$0xff]  }
   0xa   :  { %v2499_v27 = vld [vmem:[%s3430_s0 + $0x1d8] sm:$0xff]   ;;  %v2500_v28 = vld [vmem:[%s3430_s0 + $0x50] sm:$0xff]   ;;  %v2501_v29 = vld [vmem:[%s3430_s0 + $0x1e0] sm:$0xff]  }
   0xb   :  { %2245 = vmatpush3.bf16.msra.mxu0 %v2474_v2  ;;  %2466 = vmatpush3.bf16.msra.mxu1 %v2474_v2  ;;  %v2502_v30 = vld [vmem:[%s3430_s0 + $0x58] sm:$0xff]   ;;  %v2503_v31 = vld [vmem:[%s3430_s0 + $0x1e8] sm:$0xff]   ;;  %v2504_v32 = vld [vmem:[%s3430_s0 + $0x60] sm:$0xff]  }
   0xc   :  { %2246 = vmatprep.subr.bf16.mxu0 %v2475_v3  ;;  %2459 = vmatprep.subr.bf16.mxu1 %v2475_v3  ;;  %v2505_v33 = vld [vmem:[%s3430_s0 + $0x1f0] sm:$0xff]   ;;  %v2506_v34 = vld [vmem:[%s3430_s0 + $0x68] sm:$0xff]   ;;  %v2507_v35 = vld [vmem:[%s3430_s0 + $0x1f8] sm:$0xff]  }
   0xd   :  { %v2508_v36 = vld [vmem:[%s3430_s0 + $0x70] sm:$0xff]   ;;  %v2509_v37 = vld [vmem:[%s3430_s0 + $0x200] sm:$0xff]   ;;  %v2510_v38 = vld [vmem:[%s3430_s0 + $0x78] sm:$0xff]  }
   0xe   :  { %v2511_v39 = vld [vmem:[%s3430_s0 + $0x208] sm:$0xff]   ;;  %v2512_v40 = vld [vmem:[%s3430_s0 + $0x80] sm:$0xff]   ;;  %v2513_v41 = vld [vmem:[%s3430_s0 + $0x210] sm:$0xff]  }
   0xf   :  { %2247 = vmatpush3.bf16.msra.mxu0 %v2475_v3  ;;  %2467 = vmatpush3.bf16.msra.mxu1 %v2475_v3  ;;  %v2514_v42 = vld [vmem:[%s3430_s0 + $0x88] sm:$0xff]   ;;  %v2515_v43 = vld [vmem:[%s3430_s0 + $0x218] sm:$0xff]   ;;  %v2516_v44 = vld [vmem:[%s3430_s0 + $0x90] sm:$0xff]  }
  0x10   :  { %2248 = vmatprep.subr.bf16.mxu0 %v2476_v6  ;;  %2460 = vmatprep.subr.bf16.mxu1 %v2476_v6  ;;  %v2517_v45 = vld [vmem:[%s3430_s0 + $0x220] sm:$0xff]   ;;  %v2518_v46 = vld [vmem:[%s3430_s0 + $0x98] sm:$0xff]   ;;  %v2519_v47 = vld [vmem:[%s3430_s0 + $0x228] sm:$0xff]  }
  0x11   :  { %v2520_v48 = vld [vmem:[%s3430_s0 + $0xa0] sm:$0xff]   ;;  %v2521_v49 = vld [vmem:[%s3430_s0 + $0x230] sm:$0xff]   ;;  %v2522_v50 = vld [vmem:[%s3430_s0 + $0xa8] sm:$0xff]  }
  0x12   :  { %v2523_v51 = vld [vmem:[%s3430_s0 + $0x238] sm:$0xff]   ;;  %v2524_v52 = vld [vmem:[%s3430_s0 + $0xb0] sm:$0xff]   ;;  %v2525_v53 = vld [vmem:[%s3430_s0 + $0x240] sm:$0xff]  }
  0x13   :  { %2249 = vmatpush3.bf16.msra.mxu0 %v2476_v6  ;;  %2468 = vmatpush3.bf16.msra.mxu1 %v2476_v6  ;;  %v2526_v54 = vld [vmem:[%s3430_s0 + $0xb8] sm:$0xff]   ;;  %v2527_v55 = vld [vmem:[%s3430_s0 + $0x248] sm:$0xff]   ;;  %v2528_v56 = vld [vmem:[%s3430_s0 + $0xc0] sm:$0xff]  }
  0x14   :  { %2250 = vmatprep.subr.bf16.mxu0 %v2477_v7  ;;  %2461 = vmatprep.subr.bf16.mxu1 %v2477_v7  ;;  %v2529_v57 = vld [vmem:[%s3430_s0 + $0x250] sm:$0xff]   ;;  %v2530_v58 = vld [vmem:[%s3430_s0 + $0xc8] sm:$0xff]   ;;  %v2531_v59 = vld [vmem:[%s3430_s0 + $0x258] sm:$0xff]  }
  0x15   :  { %v2532_v60 = vld [vmem:[%s3430_s0 + $0xd0] sm:$0xff]   ;;  %v2533_v61 = vld [vmem:[%s3430_s0 + $0x260] sm:$0xff]   ;;  %v2534_v62 = vld [vmem:[%s3430_s0 + $0xd8] sm:$0xff]  }
  0x16   :  { %v2535_v63 = vld [vmem:[%s3430_s0 + $0x268] sm:$0xff]   ;;  %v2536_v0 = vld [vmem:[%s3430_s0 + $0xe0] sm:$0xff]   ;;  %v2537_v1 = vld [vmem:[%s3430_s0 + $0x270] sm:$0xff]  }
  0x17   :  { %2251 = vmatpush3.bf16.msra.mxu0 %v2477_v7  ;;  %2469 = vmatpush3.bf16.msra.mxu1 %v2477_v7  ;;  %v2538_v2 = vld [vmem:[%s3430_s0 + $0xe8] sm:$0xff]   ;;  %v2539_v3 = vld [vmem:[%s3430_s0 + $0x278] sm:$0xff]   ;;  %v2540_v4 = vld [vmem:[%s3430_s0 + $0xf0] sm:$0xff]  }
  0x18   :  { %2252 = vmatprep.subr.bf16.mxu0 %v2478_v8  ;;  %2462 = vmatprep.subr.bf16.mxu1 %v2478_v8  ;;  %v2541_v5 = vld [vmem:[%s3430_s0 + $0x280] sm:$0xff]   ;;  %v2542_v6 = vld [vmem:[%s3430_s0 + $0xf8] sm:$0xff]   ;;  %v2543_v7 = vld [vmem:[%s3430_s0 + $0x288] sm:$0xff]  }
  0x1b   :  { %2253 = vmatpush3.bf16.msra.mxu0 %v2478_v8  ;;  %2470 = vmatpush3.bf16.msra.mxu1 %v2478_v8  ;;  %v2544_v8 = vld [vmem:[%s3430_s0 + $0x100] sm:$0xff]  }
  0x1c   :  { %2254 = vmatprep.subr.bf16.mxu0 %v2479_v9  ;;  %2463 = vmatprep.subr.bf16.mxu1 %v2479_v9 }
  0x1f   :  { %2255 = vmatpush3.bf16.msra.mxu0 %v2479_v9  ;;  %2471 = vmatpush3.bf16.msra.mxu1 %v2479_v9  ;;  %v2545_v9 = vld [vmem:[%s3430_s0 + $0x290] sm:$0xff]  }
  0x22   :  { %2257 = vmatmul.mubr.bf16.vlgmr.msra.gmra.mrb[0].mxu0 %v2482_v10  ;;  %2357 = vmatmul.mubr.bf16.vlgmr.msra.gmra.mrb[0].mxu1 %v2483_v11  ;;  %v2546_v10 = vld [vmem:[%s3430_s0 + $0x108] sm:$0xff]   ;;  %v2547_v11 = vld [vmem:[%s3430_s0 + $0x298] sm:$0xff]  }
  0x23   :  { %2260 = vmatprep.mubr.bf16.mxu0 %v2484_v12  ;;  %2360 = vmatprep.mubr.bf16.mxu1 %v2485_v13  ;;  %v2548_v12 = vld [vmem:[%s3430_s0 + $0x110] sm:$0xff]   ;;  %v2549_v13 = vld [vmem:[%s3430_s0 + $0x2a0] sm:$0xff]  }
  0x2a   :  { %2261 = vmatmul.mubr.bf16.gmra.mrb[4].mxu0 %v2486_v14  ;;  %2361 = vmatmul.mubr.bf16.gmra.mrb[4].mxu1 %v2487_v15  ;;  %v2550_v14 = vld [vmem:[%s3430_s0 + $0x118] sm:$0xff]   ;;  %v2551_v15 = vld [vmem:[%s3430_s0 + $0x2a8] sm:$0xff]  }
  0x2b   :  { %2264 = vmatprep.mubr.bf16.mxu0 %v2488_v16  ;;  %2364 = vmatprep.mubr.bf16.mxu1 %v2489_v17  ;;  %v2552_v16 = vld [vmem:[%s3430_s0 + $0x120] sm:$0xff]   ;;  %v2553_v17 = vld [vmem:[%s3430_s0 + $0x2b0] sm:$0xff]  }
  0x32   :  { %2265 = vmatmul.mubr.bf16.gmra.mrb[8].mxu0 %v2490_v18  ;;  %2365 = vmatmul.mubr.bf16.gmra.mrb[8].mxu1 %v2491_v19  ;;  %v2554_v18 = vld [vmem:[%s3430_s0 + $0x128] sm:$0xff]   ;;  %v2555_v19 = vld [vmem:[%s3430_s0 + $0x2b8] sm:$0xff]  }
  0x33   :  { %2268 = vmatprep.mubr.bf16.mxu0 %v2492_v20  ;;  %2368 = vmatprep.mubr.bf16.mxu1 %v2493_v21  ;;  %v2556_v20 = vld [vmem:[%s3430_s0 + $0x130] sm:$0xff]   ;;  %v2557_v21 = vld [vmem:[%s3430_s0 + $0x2c0] sm:$0xff]  }
  0x3a   :  { %2269 = vmatmul.mubr.bf16.gmra.mrb[12].mxu0 %v2494_v22  ;;  %2369 = vmatmul.mubr.bf16.gmra.mrb[12].mxu1 %v2495_v23  ;;  %v2558_v22 = vld [vmem:[%s3430_s0 + $0x138] sm:$0xff]   ;;  %v2559_v23 = vld [vmem:[%s3430_s0 + $0x2c8] sm:$0xff]  }
  0x3b   :  { %2272 = vmatprep.mubr.bf16.mxu0 %v2496_v24  ;;  %2372 = vmatprep.mubr.bf16.mxu1 %v2497_v25  ;;  %v2560_v24 = vld [vmem:[%s3430_s0 + $0x140] sm:$0xff]   ;;  %v2561_v25 = vld [vmem:[%s3430_s0 + $0x2d0] sm:$0xff]  }
  0x42   :  { %2273 = vmatmul.mubr.bf16.gmra.mrb[16].mxu0 %v2498_v26  ;;  %2373 = vmatmul.mubr.bf16.gmra.mrb[16].mxu1 %v2499_v27  ;;  %v2562_v26 = vld [vmem:[%s3430_s0 + $0x148] sm:$0xff]   ;;  %v2563_v27 = vld [vmem:[%s3430_s0 + $0x2d8] sm:$0xff]  }
  0x43   :  { %2276 = vmatprep.mubr.bf16.mxu0 %v2500_v28  ;;  %2376 = vmatprep.mubr.bf16.mxu1 %v2501_v29  ;;  %v2564_v28 = vld [vmem:[%s3430_s0 + $0x150] sm:$0xff]   ;;  %v2565_v29 = vld [vmem:[%s3430_s0 + $0x2e0] sm:$0xff]  }
  0x4a   :  { %2277 = vmatmul.mubr.bf16.gmra.mrb[20].mxu0 %v2502_v30  ;;  %2377 = vmatmul.mubr.bf16.gmra.mrb[20].mxu1 %v2503_v31  ;;  %v2566_v30 = vld [vmem:[%s3430_s0 + $0x158] sm:$0xff]   ;;  %v2567_v31 = vld [vmem:[%s3430_s0 + $0x2e8] sm:$0xff]  }
  0x4b   :  { %2280 = vmatprep.mubr.bf16.mxu0 %v2504_v32  ;;  %2380 = vmatprep.mubr.bf16.mxu1 %v2505_v33  ;;  %v2568_v32 = vld [vmem:[%s3430_s0 + $0x160] sm:$0xff]   ;;  %v2569_v33 = vld [vmem:[%s3430_s0 + $0x2f0] sm:$0xff]  }
  0x52   :  { %2281 = vmatmul.mubr.bf16.gmra.mrb[24].mxu0 %v2506_v34  ;;  %2381 = vmatmul.mubr.bf16.gmra.mrb[24].mxu1 %v2507_v35  ;;  %v2570_v34 = vld [vmem:[%s3430_s0 + $0x168] sm:$0xff]   ;;  %v2571_v35 = vld [vmem:[%s3430_s0 + $0x2f8] sm:$0xff]  }
  0x53   :  { %2284 = vmatprep.mubr.bf16.mxu0 %v2508_v36  ;;  %2384 = vmatprep.mubr.bf16.mxu1 %v2509_v37  ;;  %v2572_v36 = vld [vmem:[%s3430_s0 + $0x170] sm:$0xff]   ;;  %v2573_v37 = vld [vmem:[%s3430_s0 + $0x300] sm:$0xff]  }
  0x5a   :  { %2285 = vmatmul.mubr.bf16.gmra.mrb[28].mxu0 %v2510_v38  ;;  %2385 = vmatmul.mubr.bf16.gmra.mrb[28].mxu1 %v2511_v39  ;;  %v2574_v38 = vld [vmem:[%s3430_s0 + $0x178] sm:$0xff]   ;;  %v2575_v39 = vld [vmem:[%s3430_s0 + $0x308] sm:$0xff]  }
  0x5b   :  { %2288 = vmatprep.mubr.bf16.mxu0 %v2512_v40  ;;  %2388 = vmatprep.mubr.bf16.mxu1 %v2513_v41  ;;  %v2576_v40 = vld [vmem:[%s3430_s0 + $0x180] sm:$0xff]   ;;  %v2577_v41 = vld [vmem:[%s3430_s0 + $0x310] sm:$0xff]  }
  0x62   :  { %2289 = vmatmul.mubr.bf16.gmra.mrb[32].mxu0 %v2514_v42  ;;  %2389 = vmatmul.mubr.bf16.gmra.mrb[32].mxu1 %v2515_v43  ;;  %v2578_v42 = vld [vmem:[%s3430_s0 + $0x188] sm:$0xff]   ;;  %v2579_v43 = vld [vmem:[%s3430_s0 + $0x318] sm:$0xff]  }
  0x63   :  { %2292 = vmatprep.mubr.bf16.mxu0 %v2516_v44  ;;  %2392 = vmatprep.mubr.bf16.mxu1 %v2517_v45 }
  0x6a   :  { %2293 = vmatmul.mubr.bf16.gmra.mrb[36].mxu0 %v2518_v46  ;;  %2393 = vmatmul.mubr.bf16.gmra.mrb[36].mxu1 %v2519_v47 }
  0x6b   :  { %2296 = vmatprep.mubr.bf16.mxu0 %v2520_v48  ;;  %2396 = vmatprep.mubr.bf16.mxu1 %v2521_v49 }
  0x72   :  { %2297 = vmatmul.mubr.bf16.gmra.mrb[40].mxu0 %v2522_v50  ;;  %2397 = vmatmul.mubr.bf16.gmra.mrb[40].mxu1 %v2523_v51 }
  0x73   :  { %2300 = vmatprep.mubr.bf16.mxu0 %v2524_v52  ;;  %2400 = vmatprep.mubr.bf16.mxu1 %v2525_v53 }
  0x7a   :  { %2301 = vmatmul.mubr.bf16.gmra.mrb[44].mxu0 %v2526_v54  ;;  %2401 = vmatmul.mubr.bf16.gmra.mrb[44].mxu1 %v2527_v55 }
  0x7b   :  { %2304 = vmatprep.mubr.bf16.mxu0 %v2528_v56  ;;  %2404 = vmatprep.mubr.bf16.mxu1 %v2529_v57 }
  0x82   :  { %2305 = vmatmul.mubr.bf16.gmra.mrb[48].mxu0 %v2530_v58  ;;  %2405 = vmatmul.mubr.bf16.gmra.mrb[48].mxu1 %v2531_v59 }
  0x83   :  { %2308 = vmatprep.mubr.bf16.mxu0 %v2532_v60  ;;  %2408 = vmatprep.mubr.bf16.mxu1 %v2533_v61 }
  0x8a   :  { %2309 = vmatmul.mubr.bf16.gmra.mrb[52].mxu0 %v2534_v62  ;;  %2409 = vmatmul.mubr.bf16.gmra.mrb[52].mxu1 %v2535_v63 }
  0x8b   :  { %2312 = vmatprep.mubr.bf16.mxu0 %v2536_v0  ;;  %2412 = vmatprep.mubr.bf16.mxu1 %v2537_v1 }
  0x92   :  { %2313 = vmatmul.mubr.bf16.gmra.mrb[56].mxu0 %v2538_v2  ;;  %2413 = vmatmul.mubr.bf16.gmra.mrb[56].mxu1 %v2539_v3 }
  0x93   :  { %2316 = vmatprep.mubr.bf16.mxu0 %v2540_v4  ;;  %2416 = vmatprep.mubr.bf16.mxu1 %v2541_v5 }
  0x9a   :  { %2317 = vmatmul.mubr.bf16.gmra.mrb[60].mxu0 %v2542_v6  ;;  %2417 = vmatmul.mubr.bf16.gmra.mrb[60].mxu1 %v2543_v7 }
  0x9b   :  { %2320 = vmatprep.mubr.bf16.mxu0 %v2544_v8  ;;  %2420 = vmatprep.mubr.bf16.mxu1 %v2545_v9 }
  0xa2   :  { %2321 = vmatmul.mubr.bf16.gmra.mrb[64].mxu0 %v2546_v10  ;;  %2421 = vmatmul.mubr.bf16.gmra.mrb[64].mxu1 %v2547_v11 }
  0xa3   :  { %2324 = vmatprep.mubr.bf16.mxu0 %v2548_v12  ;;  %2424 = vmatprep.mubr.bf16.mxu1 %v2549_v13 }
  0xaa   :  { %2325 = vmatmul.mubr.bf16.gmra.mrb[68].mxu0 %v2550_v14  ;;  %2425 = vmatmul.mubr.bf16.gmra.mrb[68].mxu1 %v2551_v15 }
  0xab   :  { %2328 = vmatprep.mubr.bf16.mxu0 %v2552_v16  ;;  %2428 = vmatprep.mubr.bf16.mxu1 %v2553_v17 }
  0xb2   :  { %2329 = vmatmul.mubr.bf16.gmra.mrb[72].mxu0 %v2554_v18  ;;  %2429 = vmatmul.mubr.bf16.gmra.mrb[72].mxu1 %v2555_v19 }
  0xb3   :  { %2332 = vmatprep.mubr.bf16.mxu0 %v2556_v20  ;;  %2432 = vmatprep.mubr.bf16.mxu1 %v2557_v21 }
  0xba   :  { %2333 = vmatmul.mubr.bf16.gmra.mrb[76].mxu0 %v2558_v22  ;;  %2433 = vmatmul.mubr.bf16.gmra.mrb[76].mxu1 %v2559_v23 }
  0xbb   :  { %2336 = vmatprep.mubr.bf16.mxu0 %v2560_v24  ;;  %2436 = vmatprep.mubr.bf16.mxu1 %v2561_v25 }
  0xc2   :  { %2337 = vmatmul.mubr.bf16.gmra.mrb[80].mxu0 %v2562_v26  ;;  %2437 = vmatmul.mubr.bf16.gmra.mrb[80].mxu1 %v2563_v27 }
  0xc3   :  { %2340 = vmatprep.mubr.bf16.mxu0 %v2564_v28  ;;  %2440 = vmatprep.mubr.bf16.mxu1 %v2565_v29 }
  0xca   :  { %2341 = vmatmul.mubr.bf16.gmra.mrb[84].mxu0 %v2566_v30  ;;  %2441 = vmatmul.mubr.bf16.gmra.mrb[84].mxu1 %v2567_v31 }
  0xcb   :  { %2344 = vmatprep.mubr.bf16.mxu0 %v2568_v32  ;;  %2444 = vmatprep.mubr.bf16.mxu1 %v2569_v33 }
  0xd2   :  { %2345 = vmatmul.mubr.bf16.gmra.mrb[88].mxu0 %v2570_v34  ;;  %2445 = vmatmul.mubr.bf16.gmra.mrb[88].mxu1 %v2571_v35 }
  0xd3   :  { %2348 = vmatprep.mubr.bf16.mxu0 %v2572_v36  ;;  %2448 = vmatprep.mubr.bf16.mxu1 %v2573_v37 }
  0xda   :  { %2349 = vmatmul.mubr.bf16.gmra.mrb[92].mxu0 %v2574_v38  ;;  %2449 = vmatmul.mubr.bf16.gmra.mrb[92].mxu1 %v2575_v39 }
  0xdb   :  { %2352 = vmatprep.mubr.bf16.mxu0 %v2576_v40  ;;  %2452 = vmatprep.mubr.bf16.mxu1 %v2577_v41 }
  0xe2   :  { %2353 = vmatmul.mubr.bf16.gmra.mrb[96].mxu0 %v2578_v42  ;;  %2453 = vmatmul.mubr.bf16.gmra.mrb[96].mxu1 %v2579_v43 }
  0xf5   :  { %v2924_v44 = vpop.f32.mrb[0].mxu0  ;;  %v2926_v45 = vpop.f32.mrb[0].mxu1 }
  0xf6   :  { %v2928_v46 = vpop.f32.mrb[1].mxu0  ;;  %v2930_v47 = vpop.f32.mrb[1].mxu1 }
  0xf7   :  { %v2932_v48 = vpop.f32.mrb[2].mxu0  ;;  %v2934_v49 = vpop.f32.mrb[2].mxu1 }
  0xf8   :  { %v2936_v50 = vpop.f32.mrb[3].mxu0  ;;  %v2938_v51 = vpop.f32.mrb[3].mxu1 }
  0xfd   :  { %v2940_v52 = vpop.f32.mrb[4].mxu0  ;;  %v2942_v53 = vpop.f32.mrb[4].mxu1 }
  0xfe   :  { %v2944_v54 = vpop.f32.mrb[5].mxu0  ;;  %v2946_v55 = vpop.f32.mrb[5].mxu1 }
  0xff   :  { %v2948_v56 = vpop.f32.mrb[6].mxu0  ;;  %v2950_v57 = vpop.f32.mrb[6].mxu1 }
 0x100   :  { %v2952_v58 = vpop.f32.mrb[7].mxu0  ;;  %v2954_v59 = vpop.f32.mrb[7].mxu1 }
 0x105   :  { %v2956_v60 = vpop.f32.mrb[8].mxu0  ;;  %v2958_v61 = vpop.f32.mrb[8].mxu1 }
 0x106   :  { %v2960_v62 = vpop.f32.mrb[9].mxu0  ;;  %v2962_v63 = vpop.f32.mrb[9].mxu1 }
 0x107   :  { %v2964_v0 = vpop.f32.mrb[10].mxu0  ;;  %v2966_v1 = vpop.f32.mrb[10].mxu1 }
 0x108   :  { %v2968_v2 = vpop.f32.mrb[11].mxu0  ;;  %v2970_v3 = vpop.f32.mrb[11].mxu1 }
 0x10d   :  { %v2972_v4 = vpop.f32.mrb[12].mxu0  ;;  %v2974_v5 = vpop.f32.mrb[12].mxu1 }
 0x10e   :  { %v2976_v6 = vpop.f32.mrb[13].mxu0  ;;  %v2978_v7 = vpop.f32.mrb[13].mxu1 }
 0x10f   :  { %v2980_v8 = vpop.f32.mrb[14].mxu0  ;;  %v2982_v9 = vpop.f32.mrb[14].mxu1 }
 0x110   :  { %v2984_v10 = vpop.f32.mrb[15].mxu0  ;;  %v2986_v11 = vpop.f32.mrb[15].mxu1 }
 0x115   :  { %v2988_v12 = vpop.f32.mrb[16].mxu0  ;;  %v2990_v13 = vpop.f32.mrb[16].mxu1 }
 0x116   :  { %v2992_v14 = vpop.f32.mrb[17].mxu0  ;;  %v2994_v15 = vpop.f32.mrb[17].mxu1 }
 0x117   :  { %v2996_v16 = vpop.f32.mrb[18].mxu0  ;;  %v2998_v17 = vpop.f32.mrb[18].mxu1 }
 0x118   :  { %v3000_v18 = vpop.f32.mrb[19].mxu0  ;;  %v3002_v19 = vpop.f32.mrb[19].mxu1 }
 0x11d   :  { %v3004_v20 = vpop.f32.mrb[20].mxu0  ;;  %v3006_v21 = vpop.f32.mrb[20].mxu1 }
 0x11e   :  { %v3008_v22 = vpop.f32.mrb[21].mxu0  ;;  %v3010_v23 = vpop.f32.mrb[21].mxu1 }
 0x11f   :  { %v3012_v24 = vpop.f32.mrb[22].mxu0  ;;  %v3014_v25 = vpop.f32.mrb[22].mxu1 }
 0x120   :  { %3433 = vst [vmem:[#allocation2_spill] sm:$0xff] %v3012_v24  ;;  %3434 = vst [vmem:[#allocation3_spill] sm:$0xff] %v3014_v25  ;;  %v3016_v26 = vpop.f32.mrb[23].mxu0  ;;  %v3018_v27 = vpop.f32.mrb[23].mxu1 }
 0x125   :  { %v3020_v28 = vpop.f32.mrb[24].mxu0  ;;  %v3022_v29 = vpop.f32.mrb[24].mxu1 }
 0x126   :  { %3435 = vst [vmem:[#allocation4_spill] sm:$0xff] %v3020_v28  ;;  %3436 = vst [vmem:[#allocation5_spill] sm:$0xff] %v3022_v29  ;;  %v3024_v30 = vpop.f32.mrb[25].mxu0  ;;  %v3026_v31 = vpop.f32.mrb[25].mxu1 }
 0x127   :  { %v3028_v32 = vpop.f32.mrb[26].mxu0  ;;  %v3030_v33 = vpop.f32.mrb[26].mxu1 }
 0x128   :  { %3437 = vst [vmem:[#allocation6_spill] sm:$0xff] %v3028_v32  ;;  %3438 = vst [vmem:[#allocation7_spill] sm:$0xff] %v3030_v33  ;;  %v3032_v34 = vpop.f32.mrb[27].mxu0  ;;  %v3034_v35 = vpop.f32.mrb[27].mxu1 }
 0x12d   :  { %v3036_v36 = vpop.f32.mrb[28].mxu0  ;;  %v3038_v37 = vpop.f32.mrb[28].mxu1 }
 0x12e   :  { %3439 = vst [vmem:[#allocation8_spill] sm:$0xff] %v3036_v36  ;;  %3440 = vst [vmem:[#allocation9_spill] sm:$0xff] %v3038_v37  ;;  %v3040_v38 = vpop.f32.mrb[29].mxu0  ;;  %v3042_v39 = vpop.f32.mrb[29].mxu1 }
 0x12f   :  { %3441 = vst [vmem:[#allocation10_spill] sm:$0xff] %v3040_v38  ;;  %3442 = vst [vmem:[#allocation11_spill] sm:$0xff] %v3042_v39  ;;  %v3044_v40 = vpop.f32.mrb[30].mxu0  ;;  %v3046_v41 = vpop.f32.mrb[30].mxu1 }
 0x130   :  { %3443 = vst [vmem:[#allocation12_spill] sm:$0xff] %v3044_v40  ;;  %3444 = vst [vmem:[#allocation13_spill] sm:$0xff] %v3046_v41  ;;  %v3048_v42 = vpop.f32.mrb[31].mxu0  ;;  %v3050_v43 = vpop.f32.mrb[31].mxu1 }
 0x131   :  { %3445 = vst [vmem:[#allocation14_spill] sm:$0xff] %v3048_v42  ;;  %3446 = vst [vmem:[#allocation15_spill] sm:$0xff] %v3050_v43 }
 0x135   :  { %v3052_v33 = vpop.f32.mrb[32].mxu0  ;;  %v3054_v32 = vpop.f32.mrb[32].mxu1 }
 0x136   :  { %3447 = vst [vmem:[#allocation16_spill] sm:$0xff] %v3052_v33  ;;  %3448 = vst [vmem:[#allocation17_spill] sm:$0xff] %v3054_v32  ;;  %v3056_v29 = vpop.f32.mrb[33].mxu0  ;;  %v3058_v36 = vpop.f32.mrb[33].mxu1 }
 0x137   :  { %3449 = vst [vmem:[#allocation18_spill] sm:$0xff] %v3056_v29  ;;  %3450 = vst [vmem:[#allocation19_spill] sm:$0xff] %v3058_v36  ;;  %v3060_v37 = vpop.f32.mrb[34].mxu0  ;;  %v3062_v28 = vpop.f32.mrb[34].mxu1 }
 0x138   :  { %3451 = vst [vmem:[#allocation20_spill] sm:$0xff] %v3060_v37  ;;  %3452 = vst [vmem:[#allocation21_spill] sm:$0xff] %v3062_v28  ;;  %v3064_v39 = vpop.f32.mrb[35].mxu0  ;;  %v3066_v40 = vpop.f32.mrb[35].mxu1 }
 0x139   :  { %3453 = vst [vmem:[#allocation22_spill] sm:$0xff] %v3064_v39  ;;  %3454 = vst [vmem:[#allocation23_spill] sm:$0xff] %v3066_v40 }
 0x13d   :  { %v3068_v41 = vpop.f32.mrb[36].mxu0  ;;  %v3070_v42 = vpop.f32.mrb[36].mxu1 }
 0x13e   :  { %3455 = vst [vmem:[#allocation24_spill] sm:$0xff] %v3068_v41  ;;  %3456 = vst [vmem:[#allocation25_spill] sm:$0xff] %v3070_v42  ;;  %v3072_v43 = vpop.f32.mrb[37].mxu0  ;;  %v3074_v33 = vpop.f32.mrb[37].mxu1 }
 0x13f   :  { %3457 = vst [vmem:[#allocation26_spill] sm:$0xff] %v3072_v43  ;;  %3458 = vst [vmem:[#allocation27_spill] sm:$0xff] %v3074_v33  ;;  %v3076_v32 = vpop.f32.mrb[38].mxu0  ;;  %v3078_v29 = vpop.f32.mrb[38].mxu1 }
 0x140   :  { %3459 = vst [vmem:[#allocation28_spill] sm:$0xff] %v3076_v32  ;;  %3460 = vst [vmem:[#allocation29_spill] sm:$0xff] %v3078_v29  ;;  %v3080_v36 = vpop.f32.mrb[39].mxu0  ;;  %v3082_v37 = vpop.f32.mrb[39].mxu1 }
 0x141   :  { %3461 = vst [vmem:[#allocation30_spill] sm:$0xff] %v3080_v36  ;;  %3462 = vst [vmem:[#allocation31_spill] sm:$0xff] %v3082_v37 }
 0x145   :  { %v3084_v28 = vpop.f32.mrb[40].mxu0  ;;  %v3086_v39 = vpop.f32.mrb[40].mxu1 }
 0x146   :  { %3463 = vst [vmem:[#allocation32_spill] sm:$0xff] %v3084_v28  ;;  %3464 = vst [vmem:[#allocation33_spill] sm:$0xff] %v3086_v39  ;;  %v3088_v40 = vpop.f32.mrb[41].mxu0  ;;  %v3090_v41 = vpop.f32.mrb[41].mxu1 }
 0x147   :  { %3465 = vst [vmem:[#allocation34_spill] sm:$0xff] %v3088_v40  ;;  %3466 = vst [vmem:[#allocation35_spill] sm:$0xff] %v3090_v41  ;;  %v3092_v42 = vpop.f32.mrb[42].mxu0  ;;  %v3094_v43 = vpop.f32.mrb[42].mxu1 }
 0x148   :  { %3467 = vst [vmem:[#allocation36_spill] sm:$0xff] %v3092_v42  ;;  %3468 = vst [vmem:[#allocation37_spill] sm:$0xff] %v3094_v43  ;;  %v3096_v33 = vpop.f32.mrb[43].mxu0  ;;  %v3098_v32 = vpop.f32.mrb[43].mxu1 }
 0x149   :  { %3469 = vst [vmem:[#allocation38_spill] sm:$0xff] %v3096_v33  ;;  %3470 = vst [vmem:[#allocation39_spill] sm:$0xff] %v3098_v32 }
 0x14d   :  { %v3100_v29 = vpop.f32.mrb[44].mxu0  ;;  %v3102_v36 = vpop.f32.mrb[44].mxu1 }
 0x14e   :  { %3471 = vst [vmem:[#allocation40_spill] sm:$0xff] %v3100_v29  ;;  %3472 = vst [vmem:[#allocation41_spill] sm:$0xff] %v3102_v36  ;;  %v3104_v37 = vpop.f32.mrb[45].mxu0  ;;  %v3106_v28 = vpop.f32.mrb[45].mxu1 }
 0x14f   :  { %3473 = vst [vmem:[#allocation42_spill] sm:$0xff] %v3104_v37  ;;  %3474 = vst [vmem:[#allocation43_spill] sm:$0xff] %v3106_v28  ;;  %v3108_v39 = vpop.f32.mrb[46].mxu0  ;;  %v3110_v40 = vpop.f32.mrb[46].mxu1 }
 0x150   :  { %3475 = vst [vmem:[#allocation44_spill] sm:$0xff] %v3108_v39  ;;  %3476 = vst [vmem:[#allocation45_spill] sm:$0xff] %v3110_v40  ;;  %v3112_v41 = vpop.f32.mrb[47].mxu0  ;;  %v3114_v42 = vpop.f32.mrb[47].mxu1  ;;  %v3125_v39 = vld [vmem:[%s3431_s2] ss:$0 sm:$0xff] }
 0x151   :  { %3477 = vst [vmem:[#allocation46_spill] sm:$0xff] %v3112_v41  ;;  %3478 = vst [vmem:[#allocation47_spill] sm:$0xff] %v3114_v42 }
 0x155   :  { %v2306_v43 = vpop.f32.mrb[48].mxu0  ;;  %v2406_v33 = vpop.f32.mrb[48].mxu1 }
 0x156   :  { %v1712_v32 = vmax.f32 %v2928_v46, %v2306_v43  ;;  %v1762_v29 = vmax.f32 %v2930_v47, %v2406_v33  ;;  %v3118_v38 = vpop.f32.mrb[49].mxu0  ;;  %v3120_v36 = vpop.f32.mrb[49].mxu1 }
 0x157   :  { %3479 = vst [vmem:[#allocation48_spill] sm:$0xff] %v3118_v38  ;;  %3480 = vst [vmem:[#allocation49_spill] sm:$0xff] %v3120_v36  ;;  %v2307_v40 = vpop.f32.mrb[50].mxu0  ;;  %v2407_v28 = vpop.f32.mrb[50].mxu1 }
 0x158   :  { %v1812_v41 = vmax.f32 %v1712_v32, %v1762_v29  ;;  %v1713_v42 = vmax.f32 %v2936_v50, %v2307_v40  ;;  %v1763_v37 = vmax.f32 %v2938_v51, %v2407_v28  ;;  %v3129_v25 = vpop.f32.mrb[51].mxu0  ;;  %v3131_v46 = vpop.f32.mrb[51].mxu1 }
 0x159   :  { %3481 = vst [vmem:[#allocation50_spill] sm:$0xff] %v3131_v46 }
 0x15a   :  { %v1869_v47 = vadd.f32 %v3125_v39, %v1812_v41  ;;  %v1813_v33 = vmax.f32 %v1713_v42, %v1763_v37 }
 0x15c   :  { %v1919_v43 = vmax.f32 %v1869_v47, 0.0  ;;  %v1870_v36 = vadd.f32 %v3125_v39, %v1813_v33 }
 0x15d   :  { %v2310_v38 = vpop.f32.mrb[52].mxu0  ;;  %v2410_v24 = vpop.f32.mrb[52].mxu1 }
 0x15e   :  { %1969 = vst [vmem:[%s3432_s3] sm:$0xff] %v1919_v43  ;;  %v1920_v29 = vmax.f32 %v1870_v36, 0.0  ;;  %v1716_v50 = vmax.f32 %v2944_v54, %v2310_v38  ;;  %v1766_v51 = vmax.f32 %v2946_v55, %v2410_v24  ;;  %v1121_v28 = vpop.f32.mrb[53].mxu0  ;;  %v1521_v32 = vpop.f32.mrb[53].mxu1 }
 0x15f   :  { %v1714_v40 = vmax.f32 %v2924_v44, %v1121_v28  ;;  %v1764_v37 = vmax.f32 %v2926_v45, %v1521_v32  ;;  %v2311_v41 = vpop.f32.mrb[54].mxu0  ;;  %v2411_v42 = vpop.f32.mrb[54].mxu1 }
 0x160   :  { %1970 = vst [vmem:[%s3432_s3 + $0x8] sm:$0xff] %v1920_v29  ;;  %v1816_v47 = vmax.f32 %v1716_v50, %v1766_v51  ;;  %v1717_v33 = vmax.f32 %v2952_v58, %v2311_v41  ;;  %v1767_v36 = vmax.f32 %v2954_v59, %v2411_v42  ;;  %v1124_v54 = vpop.f32.mrb[55].mxu0  ;;  %v1524_v38 = vpop.f32.mrb[55].mxu1 }
 0x161   :  { %v1814_v55 = vmax.f32 %v1714_v40, %v1764_v37  ;;  %v1715_v24 = vmax.f32 %v2932_v48, %v1124_v54  ;;  %v1765_v44 = vmax.f32 %v2934_v49, %v1524_v38 }
 0x162   :  { %v1873_v45 = vadd.f32 %v3125_v39, %v1816_v47  ;;  %v1817_v43 = vmax.f32 %v1717_v33, %v1767_v36 }
 0x163   :  { %v1871_v28 = vadd.f32 %v3125_v39, %v1814_v55  ;;  %v1815_v32 = vmax.f32 %v1715_v24, %v1765_v44 }
 0x164   :  { %v1923_v46 = vmax.f32 %v1873_v45, 0.0  ;;  %v1874_v29 = vadd.f32 %v3125_v39, %v1817_v43 }
 0x165   :  { %v1921_v50 = vmax.f32 %v1871_v28, 0.0  ;;  %v1872_v58 = vadd.f32 %v3125_v39, %v1815_v32  ;;  %v2314_v59 = vpop.f32.mrb[56].mxu0  ;;  %v2414_v51 = vpop.f32.mrb[56].mxu1 }
 0x166   :  { %1973 = vst [vmem:[%s3432_s3 + $0x20] sm:$0xff] %v1923_v46  ;;  %v1924_v48 = vmax.f32 %v1874_v29, 0.0  ;;  %v1720_v49 = vmax.f32 %v2960_v62, %v2314_v59  ;;  %v1770_v40 = vmax.f32 %v2962_v63, %v2414_v51  ;;  %v1137_v37 = vpop.f32.mrb[57].mxu0  ;;  %v1537_v41 = vpop.f32.mrb[57].mxu1 }
 0x167   :  { %1971 = vst [vmem:[%s3432_s3 + $0x10] sm:$0xff] %v1921_v50  ;;  %v1922_v42 = vmax.f32 %v1872_v58, 0.0  ;;  %v1718_v47 = vmax.f32 %v2940_v52, %v1137_v37  ;;  %v1768_v33 = vmax.f32 %v2942_v53, %v1537_v41  ;;  %v2315_v36 = vpop.f32.mrb[58].mxu0  ;;  %v2415_v54 = vpop.f32.mrb[58].mxu1 }
 0x168   :  { %1974 = vst [vmem:[%s3432_s3 + $0x28] sm:$0xff] %v1924_v48  ;;  %v1820_v62 = vmax.f32 %v1720_v49, %v1770_v40  ;;  %v1721_v63 = vmax.f32 %v2968_v2, %v2315_v36  ;;  %v1771_v46 = vmax.f32 %v2970_v3, %v2415_v54  ;;  %v1140_v38 = vpop.f32.mrb[59].mxu0  ;;  %v1540_v55 = vpop.f32.mrb[59].mxu1 }
 0x169   :  { %1972 = vst [vmem:[%s3432_s3 + $0x18] sm:$0xff] %v1922_v42  ;;  %v1818_v52 = vmax.f32 %v1718_v47, %v1768_v33  ;;  %v1719_v53 = vmax.f32 %v2948_v56, %v1140_v38  ;;  %v1769_v24 = vmax.f32 %v2950_v57, %v1540_v55 }
 0x16a   :  { %v1877_v44 = vadd.f32 %v3125_v39, %v1820_v62  ;;  %v1821_v45 = vmax.f32 %v1721_v63, %v1771_v46 }
 0x16b   :  { %v1875_v43 = vadd.f32 %v3125_v39, %v1818_v52  ;;  %v1819_v28 = vmax.f32 %v1719_v53, %v1769_v24 }
 0x16c   :  { %v1927_v2 = vmax.f32 %v1877_v44, 0.0  ;;  %v1878_v3 = vadd.f32 %v3125_v39, %v1821_v45 }
 0x16d   :  { %v1925_v32 = vmax.f32 %v1875_v43, 0.0  ;;  %v1876_v29 = vadd.f32 %v3125_v39, %v1819_v28  ;;  %v2318_v50 = vpop.f32.mrb[60].mxu0  ;;  %v2418_v58 = vpop.f32.mrb[60].mxu1 }
 0x16e   :  { %1977 = vst [vmem:[%s3432_s3 + $0x40] sm:$0xff] %v1927_v2  ;;  %v1928_v56 = vmax.f32 %v1878_v3, 0.0  ;;  %v1724_v57 = vmax.f32 %v2976_v6, %v2318_v50  ;;  %v1774_v59 = vmax.f32 %v2978_v7, %v2418_v58  ;;  %v1153_v51 = vpop.f32.mrb[61].mxu0  ;;  %v1553_v48 = vpop.f32.mrb[61].mxu1 }
 0x16f   :  { %1975 = vst [vmem:[%s3432_s3 + $0x30] sm:$0xff] %v1925_v32  ;;  %v1926_v49 = vmax.f32 %v1876_v29, 0.0  ;;  %v1722_v40 = vmax.f32 %v2956_v60, %v1153_v51  ;;  %v1772_v37 = vmax.f32 %v2958_v61, %v1553_v48  ;;  %v2319_v41 = vpop.f32.mrb[62].mxu0  ;;  %v2419_v42 = vpop.f32.mrb[62].mxu1 }
 0x170   :  { %1978 = vst [vmem:[%s3432_s3 + $0x48] sm:$0xff] %v1928_v56  ;;  %v1824_v6 = vmax.f32 %v1724_v57, %v1774_v59  ;;  %v1725_v7 = vmax.f32 %v2984_v10, %v2319_v41  ;;  %v1775_v47 = vmax.f32 %v2986_v11, %v2419_v42  ;;  %v1156_v33 = vpop.f32.mrb[63].mxu0  ;;  %v1556_v36 = vpop.f32.mrb[63].mxu1 }
 0x171   :  { %1976 = vst [vmem:[%s3432_s3 + $0x38] sm:$0xff] %v1926_v49  ;;  %v1822_v60 = vmax.f32 %v1722_v40, %v1772_v37  ;;  %v1723_v61 = vmax.f32 %v2964_v0, %v1156_v33  ;;  %v1773_v54 = vmax.f32 %v2966_v1, %v1556_v36 }
 0x172   :  { %v1881_v62 = vadd.f32 %v3125_v39, %v1824_v6  ;;  %v1825_v63 = vmax.f32 %v1725_v7, %v1775_v47 }
 0x173   :  { %v1879_v46 = vadd.f32 %v3125_v39, %v1822_v60  ;;  %v1823_v38 = vmax.f32 %v1723_v61, %v1773_v54 }
 0x174   :  { %v1931_v10 = vmax.f32 %v1881_v62, 0.0  ;;  %v1882_v11 = vadd.f32 %v3125_v39, %v1825_v63 }
 0x175   :  { %v1929_v55 = vmax.f32 %v1879_v46, 0.0  ;;  %v1880_v52 = vadd.f32 %v3125_v39, %v1823_v38  ;;  %v2322_v53 = vpop.f32.mrb[64].mxu0  ;;  %v2422_v24 = vpop.f32.mrb[64].mxu1 }
 0x176   :  { %1981 = vst [vmem:[%s3432_s3 + $0x60] sm:$0xff] %v1931_v10  ;;  %v1932_v0 = vmax.f32 %v1882_v11, 0.0  ;;  %v1728_v1 = vmax.f32 %v2992_v14, %v2322_v53  ;;  %v1778_v44 = vmax.f32 %v2994_v15, %v2422_v24  ;;  %v1169_v45 = vpop.f32.mrb[65].mxu0  ;;  %v1569_v43 = vpop.f32.mrb[65].mxu1 }
 0x177   :  { %1979 = vst [vmem:[%s3432_s3 + $0x50] sm:$0xff] %v1929_v55  ;;  %v1930_v28 = vmax.f32 %v1880_v52, 0.0  ;;  %v1726_v2 = vmax.f32 %v2972_v4, %v1169_v45  ;;  %v1776_v3 = vmax.f32 %v2974_v5, %v1569_v43  ;;  %v2323_v32 = vpop.f32.mrb[66].mxu0  ;;  %v2423_v29 = vpop.f32.mrb[66].mxu1 }
 0x178   :  { %1982 = vst [vmem:[%s3432_s3 + $0x68] sm:$0xff] %v1932_v0  ;;  %v1828_v14 = vmax.f32 %v1728_v1, %v1778_v44  ;;  %v1729_v15 = vmax.f32 %v3000_v18, %v2323_v32  ;;  %v1779_v50 = vmax.f32 %v3002_v19, %v2423_v29  ;;  %v1172_v58 = vpop.f32.mrb[67].mxu0  ;;  %v1572_v56 = vpop.f32.mrb[67].mxu1 }
 0x179   :  { %1980 = vst [vmem:[%s3432_s3 + $0x58] sm:$0xff] %v1930_v28  ;;  %v1826_v4 = vmax.f32 %v1726_v2, %v1776_v3  ;;  %v1727_v5 = vmax.f32 %v2980_v8, %v1172_v58  ;;  %v1777_v57 = vmax.f32 %v2982_v9, %v1572_v56  ;;  %v3482_v58 = vld [vmem:[#allocation2_spill] sm:$0xff]  ;;  %v3483_v56 = vld [vmem:[#allocation3_spill] sm:$0xff] }
 0x17a   :  { %v1885_v59 = vadd.f32 %v3125_v39, %v1828_v14  ;;  %v1829_v51 = vmax.f32 %v1729_v15, %v1779_v50 }
 0x17b   :  { %v1883_v48 = vadd.f32 %v3125_v39, %v1826_v4  ;;  %v1827_v49 = vmax.f32 %v1727_v5, %v1777_v57 }
 0x17c   :  { %v1935_v18 = vmax.f32 %v1885_v59, 0.0  ;;  %v1886_v19 = vadd.f32 %v3125_v39, %v1829_v51 }
 0x17d   :  { %v1933_v40 = vmax.f32 %v1883_v48, 0.0  ;;  %v1884_v37 = vadd.f32 %v3125_v39, %v1827_v49  ;;  %v2326_v41 = vpop.f32.mrb[68].mxu0  ;;  %v2426_v42 = vpop.f32.mrb[68].mxu1 }
 0x17e   :  { %1985 = vst [vmem:[%s3432_s3 + $0x80] sm:$0xff] %v1935_v18  ;;  %v1936_v8 = vmax.f32 %v1886_v19, 0.0  ;;  %v1732_v9 = vmax.f32 %v3008_v22, %v2326_v41  ;;  %v1782_v6 = vmax.f32 %v3010_v23, %v2426_v42  ;;  %v1185_v7 = vpop.f32.mrb[69].mxu0  ;;  %v1585_v47 = vpop.f32.mrb[69].mxu1  ;;  %v3485_v42 = vld [vmem:[#allocation11_spill] sm:$0xff] }
 0x17f   :  { %1983 = vst [vmem:[%s3432_s3 + $0x70] sm:$0xff] %v1933_v40  ;;  %v1934_v33 = vmax.f32 %v1884_v37, 0.0  ;;  %v1730_v36 = vmax.f32 %v2988_v12, %v1185_v7  ;;  %v1780_v60 = vmax.f32 %v2990_v13, %v1585_v47  ;;  %v2327_v61 = vpop.f32.mrb[70].mxu0  ;;  %v2427_v54 = vpop.f32.mrb[70].mxu1  ;;  %v3484_v37 = vld [vmem:[#allocation10_spill] sm:$0xff]  ;;  %v3486_v47 = vld [vmem:[#allocation4_spill] sm:$0xff] }
 0x180   :  { %1986 = vst [vmem:[%s3432_s3 + $0x88] sm:$0xff] %v1936_v8  ;;  %v1832_v22 = vmax.f32 %v1732_v9, %v1782_v6  ;;  %v1733_v23 = vmax.f32 %v3016_v26, %v2327_v61  ;;  %v1783_v62 = vmax.f32 %v3018_v27, %v2427_v54  ;;  %v1188_v63 = vpop.f32.mrb[71].mxu0  ;;  %v1588_v46 = vpop.f32.mrb[71].mxu1 }
 0x181   :  { %1984 = vst [vmem:[%s3432_s3 + $0x78] sm:$0xff] %v1934_v33  ;;  %v1830_v12 = vmax.f32 %v1730_v36, %v1780_v60  ;;  %v1731_v13 = vmax.f32 %v2996_v16, %v1188_v63  ;;  %v1781_v38 = vmax.f32 %v2998_v17, %v1588_v46  ;;  %v3487_v36 = vld [vmem:[#allocation5_spill] sm:$0xff]  ;;  %v3489_v63 = vld [vmem:[#allocation15_spill] sm:$0xff] }
 0x182   :  { %v1889_v10 = vadd.f32 %v3125_v39, %v1832_v22  ;;  %v1833_v11 = vmax.f32 %v1733_v23, %v1783_v62  ;;  %v3488_v23 = vld [vmem:[#allocation14_spill] sm:$0xff] }
 0x183   :  { %v1887_v55 = vadd.f32 %v3125_v39, %v1830_v12  ;;  %v1831_v52 = vmax.f32 %v1731_v13, %v1781_v38 }
 0x184   :  { %v1939_v26 = vmax.f32 %v1889_v10, 0.0  ;;  %v1890_v27 = vadd.f32 %v3125_v39, %v1833_v11  ;;  %v3490_v10 = vld [vmem:[#allocation6_spill] sm:$0xff] }
 0x185   :  { %v1937_v53 = vmax.f32 %v1887_v55, 0.0  ;;  %v1888_v24 = vadd.f32 %v3125_v39, %v1831_v52  ;;  %v2330_v0 = vpop.f32.mrb[72].mxu0  ;;  %v2430_v1 = vpop.f32.mrb[72].mxu1  ;;  %v3491_v55 = vld [vmem:[#allocation7_spill] sm:$0xff] }
 0x186   :  { %1989 = vst [vmem:[%s3432_s3 + $0xa0] sm:$0xff] %v1939_v26  ;;  %v1940_v16 = vmax.f32 %v1890_v27, 0.0  ;;  %v1736_v17 = vmax.f32 %v3024_v30, %v2330_v0  ;;  %v1786_v44 = vmax.f32 %v3026_v31, %v2430_v1  ;;  %v1201_v45 = vpop.f32.mrb[73].mxu0  ;;  %v1601_v43 = vpop.f32.mrb[73].mxu1 }
 0x187   :  { %1987 = vst [vmem:[%s3432_s3 + $0x90] sm:$0xff] %v1937_v53  ;;  %v1938_v28 = vmax.f32 %v1888_v24, 0.0  ;;  %v1734_v2 = vmax.f32 %v3004_v20, %v1201_v45  ;;  %v1784_v3 = vmax.f32 %v3006_v21, %v1601_v43  ;;  %v2331_v32 = vpop.f32.mrb[74].mxu0  ;;  %v2431_v29 = vpop.f32.mrb[74].mxu1 }
 0x188   :  { %1990 = vst [vmem:[%s3432_s3 + $0xa8] sm:$0xff] %v1940_v16  ;;  %v1836_v30 = vmax.f32 %v1736_v17, %v1786_v44  ;;  %v1737_v31 = vmax.f32 %v3032_v34, %v2331_v32  ;;  %v1787_v14 = vmax.f32 %v3034_v35, %v2431_v29  ;;  %v1204_v15 = vpop.f32.mrb[75].mxu0  ;;  %v1604_v50 = vpop.f32.mrb[75].mxu1 }
 0x189   :  { %1988 = vst [vmem:[%s3432_s3 + $0x98] sm:$0xff] %v1938_v28  ;;  %v1834_v20 = vmax.f32 %v1734_v2, %v1784_v3  ;;  %v1735_v21 = vmax.f32 %v3482_v58, %v1204_v15  ;;  %v1785_v4 = vmax.f32 %v3483_v56, %v1604_v50  ;;  %v3492_v28 = vld [vmem:[#allocation18_spill] sm:$0xff]  ;;  %v3493_v3 = vld [vmem:[#allocation19_spill] sm:$0xff]  ;;  %v3495_v50 = vld [vmem:[#allocation9_spill] sm:$0xff] }
 0x18a   :  { %v1893_v5 = vadd.f32 %v3125_v39, %v1836_v30  ;;  %v1837_v57 = vmax.f32 %v1737_v31, %v1787_v14  ;;  %v3494_v14 = vld [vmem:[#allocation8_spill] sm:$0xff] }
 0x18b   :  { %v1891_v59 = vadd.f32 %v3125_v39, %v1834_v20  ;;  %v1835_v51 = vmax.f32 %v1735_v21, %v1785_v4  ;;  %v3496_v4 = vld [vmem:[#allocation22_spill] sm:$0xff] }
 0x18c   :  { %v1943_v34 = vmax.f32 %v1893_v5, 0.0  ;;  %v1894_v35 = vadd.f32 %v3125_v39, %v1837_v57  ;;  %v3497_v57 = vld [vmem:[#allocation23_spill] sm:$0xff] }
 0x18d   :  { %v1941_v48 = vmax.f32 %v1891_v59, 0.0  ;;  %v1892_v49 = vadd.f32 %v3125_v39, %v1835_v51  ;;  %v2334_v18 = vpop.f32.mrb[76].mxu0  ;;  %v2434_v19 = vpop.f32.mrb[76].mxu1 }
 0x18e   :  { %1993 = vst [vmem:[%s3432_s3 + $0xc0] sm:$0xff] %v1943_v34  ;;  %v1944_v40 = vmax.f32 %v1894_v35, 0.0  ;;  %v1740_v41 = vmax.f32 %v3484_v37, %v2334_v18  ;;  %v1790_v8 = vmax.f32 %v3485_v42, %v2434_v19  ;;  %v1217_v9 = vpop.f32.mrb[77].mxu0  ;;  %v1617_v6 = vpop.f32.mrb[77].mxu1  ;;  %v3499_v18 = vld [vmem:[#allocation13_spill] sm:$0xff] }
 0x18f   :  { %1991 = vst [vmem:[%s3432_s3 + $0xb0] sm:$0xff] %v1941_v48  ;;  %v1942_v7 = vmax.f32 %v1892_v49, 0.0  ;;  %v1738_v33 = vmax.f32 %v3486_v47, %v1217_v9  ;;  %v1788_v60 = vmax.f32 %v3487_v36, %v1617_v6  ;;  %v2335_v61 = vpop.f32.mrb[78].mxu0  ;;  %v2435_v54 = vpop.f32.mrb[78].mxu1  ;;  %v3498_v48 = vld [vmem:[#allocation12_spill] sm:$0xff] }
 0x190   :  { %1994 = vst [vmem:[%s3432_s3 + $0xc8] sm:$0xff] %v1944_v40  ;;  %v1840_v22 = vmax.f32 %v1740_v41, %v1790_v8  ;;  %v1741_v62 = vmax.f32 %v3488_v23, %v2335_v61  ;;  %v1791_v46 = vmax.f32 %v3489_v63, %v2435_v54  ;;  %v1220_v12 = vpop.f32.mrb[79].mxu0  ;;  %v1620_v13 = vpop.f32.mrb[79].mxu1  ;;  %v3501_v54 = vld [vmem:[#allocation27_spill] sm:$0xff] }
 0x191   :  { %1992 = vst [vmem:[%s3432_s3 + $0xb8] sm:$0xff] %v1942_v7  ;;  %v1838_v38 = vmax.f32 %v1738_v33, %v1788_v60  ;;  %v1739_v11 = vmax.f32 %v3490_v10, %v1220_v12  ;;  %v1789_v52 = vmax.f32 %v3491_v55, %v1620_v13  ;;  %v3500_v60 = vld [vmem:[#allocation26_spill] sm:$0xff]  ;;  %v3503_v13 = vld [vmem:[#allocation17_spill] sm:$0xff] }
 0x192   :  { %v1897_v26 = vadd.f32 %v3125_v39, %v1840_v22  ;;  %v1841_v27 = vmax.f32 %v1741_v62, %v1791_v46  ;;  %v3502_v46 = vld [vmem:[#allocation16_spill] sm:$0xff] }
 0x193   :  { %v1895_v53 = vadd.f32 %v3125_v39, %v1838_v38  ;;  %v1839_v24 = vmax.f32 %v1739_v11, %v1789_v52  ;;  %v3504_v52 = vld [vmem:[#allocation30_spill] sm:$0xff] }
 0x194   :  { %v1947_v0 = vmax.f32 %v1897_v26, 0.0  ;;  %v1898_v1 = vadd.f32 %v3125_v39, %v1841_v27  ;;  %v3505_v27 = vld [vmem:[#allocation31_spill] sm:$0xff] }
 0x195   :  { %v1945_v16 = vmax.f32 %v1895_v53, 0.0  ;;  %v1896_v17 = vadd.f32 %v3125_v39, %v1839_v24  ;;  %v2338_v44 = vpop.f32.mrb[80].mxu0  ;;  %v2438_v45 = vpop.f32.mrb[80].mxu1 }
 0x196   :  { %1997 = vst [vmem:[%s3432_s3 + $0xe0] sm:$0xff] %v1947_v0  ;;  %v1948_v43 = vmax.f32 %v1898_v1, 0.0  ;;  %v1744_v2 = vmax.f32 %v3492_v28, %v2338_v44  ;;  %v1794_v32 = vmax.f32 %v3493_v3, %v2438_v45  ;;  %v1233_v29 = vpop.f32.mrb[81].mxu0  ;;  %v1633_v30 = vpop.f32.mrb[81].mxu1  ;;  %v3507_v44 = vld [vmem:[#allocation21_spill] sm:$0xff] }
 0x197   :  { %1995 = vst [vmem:[%s3432_s3 + $0xd0] sm:$0xff] %v1945_v16  ;;  %v1946_v31 = vmax.f32 %v1896_v17, 0.0  ;;  %v1742_v15 = vmax.f32 %v3494_v14, %v1233_v29  ;;  %v1792_v20 = vmax.f32 %v3495_v50, %v1633_v30  ;;  %v2339_v58 = vpop.f32.mrb[82].mxu0  ;;  %v2439_v21 = vpop.f32.mrb[82].mxu1  ;;  %v3506_v16 = vld [vmem:[#allocation20_spill] sm:$0xff] }
 0x198   :  { %1998 = vst [vmem:[%s3432_s3 + $0xe8] sm:$0xff] %v1948_v43  ;;  %v1844_v56 = vmax.f32 %v1744_v2, %v1794_v32  ;;  %v1745_v5 = vmax.f32 %v3496_v4, %v2339_v58  ;;  %v1795_v59 = vmax.f32 %v3497_v57, %v2439_v21  ;;  %v1236_v51 = vpop.f32.mrb[83].mxu0  ;;  %v1636_v34 = vpop.f32.mrb[83].mxu1  ;;  %v3509_v21 = vld [vmem:[#allocation35_spill] sm:$0xff] }
 0x199   :  { %1996 = vst [vmem:[%s3432_s3 + $0xd8] sm:$0xff] %v1946_v31  ;;  %v1842_v35 = vmax.f32 %v1742_v15, %v1792_v20  ;;  %v1743_v49 = vmax.f32 %v3498_v48, %v1236_v51  ;;  %v1793_v19 = vmax.f32 %v3499_v18, %v1636_v34  ;;  %v3508_v20 = vld [vmem:[#allocation34_spill] sm:$0xff]  ;;  %v3511_v34 = vld [vmem:[#allocation25_spill] sm:$0xff] }
 0x19a   :  { %v1901_v40 = vadd.f32 %v3125_v39, %v1844_v56  ;;  %v1845_v37 = vmax.f32 %v1745_v5, %v1795_v59  ;;  %v3510_v59 = vld [vmem:[#allocation24_spill] sm:$0xff] }
 0x19b   :  { %v1899_v41 = vadd.f32 %v3125_v39, %v1842_v35  ;;  %v1843_v42 = vmax.f32 %v1743_v49, %v1793_v19  ;;  %v3512_v19 = vld [vmem:[#allocation38_spill] sm:$0xff] }
 0x19c   :  { %v1951_v8 = vmax.f32 %v1901_v40, 0.0  ;;  %v1902_v9 = vadd.f32 %v3125_v39, %v1845_v37  ;;  %v3513_v37 = vld [vmem:[#allocation39_spill] sm:$0xff] }
 0x19d   :  { %v1949_v6 = vmax.f32 %v1899_v41, 0.0  ;;  %v1900_v7 = vadd.f32 %v3125_v39, %v1843_v42  ;;  %v2342_v47 = vpop.f32.mrb[84].mxu0  ;;  %v2442_v33 = vpop.f32.mrb[84].mxu1 }
 0x19e   :  { %2001 = vst [vmem:[%s3432_s3 + $0x100] sm:$0xff] %v1951_v8  ;;  %v1952_v36 = vmax.f32 %v1902_v9, 0.0  ;;  %v1748_v61 = vmax.f32 %v3500_v60, %v2342_v47  ;;  %v1798_v22 = vmax.f32 %v3501_v54, %v2442_v33  ;;  %v1249_v23 = vpop.f32.mrb[85].mxu0  ;;  %v1649_v62 = vpop.f32.mrb[85].mxu1  ;;  %v3515_v47 = vld [vmem:[#allocation29_spill] sm:$0xff] }
 0x19f   :  { %1999 = vst [vmem:[%s3432_s3 + $0xf0] sm:$0xff] %v1949_v6  ;;  %v1950_v63 = vmax.f32 %v1900_v7, 0.0  ;;  %v1746_v12 = vmax.f32 %v3502_v46, %v1249_v23  ;;  %v1796_v38 = vmax.f32 %v3503_v13, %v1649_v62  ;;  %v2343_v10 = vpop.f32.mrb[86].mxu0  ;;  %v2443_v11 = vpop.f32.mrb[86].mxu1  ;;  %v3514_v6 = vld [vmem:[#allocation28_spill] sm:$0xff] }
 0x1a0   :  { %2002 = vst [vmem:[%s3432_s3 + $0x108] sm:$0xff] %v1952_v36  ;;  %v1848_v55 = vmax.f32 %v1748_v61, %v1798_v22  ;;  %v1749_v26 = vmax.f32 %v3504_v52, %v2343_v10  ;;  %v1799_v53 = vmax.f32 %v3505_v27, %v2443_v11  ;;  %v1252_v24 = vpop.f32.mrb[87].mxu0  ;;  %v1652_v0 = vpop.f32.mrb[87].mxu1  ;;  %v3517_v11 = vld [vmem:[#allocation43_spill] sm:$0xff] }
 0x1a1   :  { %2000 = vst [vmem:[%s3432_s3 + $0xf8] sm:$0xff] %v1950_v63  ;;  %v1846_v1 = vmax.f32 %v1746_v12, %v1796_v38  ;;  %v1747_v17 = vmax.f32 %v3506_v16, %v1252_v24  ;;  %v1797_v45 = vmax.f32 %v3507_v44, %v1652_v0  ;;  %v3516_v38 = vld [vmem:[#allocation42_spill] sm:$0xff]  ;;  %v3519_v0 = vld [vmem:[#allocation33_spill] sm:$0xff] }
 0x1a2   :  { %v1905_v43 = vadd.f32 %v3125_v39, %v1848_v55  ;;  %v1849_v28 = vmax.f32 %v1749_v26, %v1799_v53  ;;  %v3518_v53 = vld [vmem:[#allocation32_spill] sm:$0xff] }
 0x1a3   :  { %v1903_v2 = vadd.f32 %v3125_v39, %v1846_v1  ;;  %v1847_v3 = vmax.f32 %v1747_v17, %v1797_v45  ;;  %v3520_v45 = vld [vmem:[#allocation46_spill] sm:$0xff] }
 0x1a4   :  { %v1955_v32 = vmax.f32 %v1905_v43, 0.0  ;;  %v1906_v29 = vadd.f32 %v3125_v39, %v1849_v28  ;;  %v3521_v28 = vld [vmem:[#allocation47_spill] sm:$0xff] }
 0x1a5   :  { %v1953_v30 = vmax.f32 %v1903_v2, 0.0  ;;  %v1904_v31 = vadd.f32 %v3125_v39, %v1847_v3  ;;  %v2346_v14 = vpop.f32.mrb[88].mxu0  ;;  %v2446_v15 = vpop.f32.mrb[88].mxu1 }
 0x1a6   :  { %2005 = vst [vmem:[%s3432_s3 + $0x120] sm:$0xff] %v1955_v32  ;;  %v1956_v50 = vmax.f32 %v1906_v29, 0.0  ;;  %v1752_v58 = vmax.f32 %v3508_v20, %v2346_v14  ;;  %v1802_v56 = vmax.f32 %v3509_v21, %v2446_v15  ;;  %v1265_v4 = vpop.f32.mrb[89].mxu0  ;;  %v1665_v5 = vpop.f32.mrb[89].mxu1  ;;  %v3523_v14 = vld [vmem:[#allocation37_spill] sm:$0xff] }
 0x1a7   :  { %2003 = vst [vmem:[%s3432_s3 + $0x110] sm:$0xff] %v1953_v30  ;;  %v1954_v57 = vmax.f32 %v1904_v31, 0.0  ;;  %v1750_v51 = vmax.f32 %v3510_v59, %v1265_v4  ;;  %v1800_v35 = vmax.f32 %v3511_v34, %v1665_v5  ;;  %v2347_v48 = vpop.f32.mrb[90].mxu0  ;;  %v2447_v49 = vpop.f32.mrb[90].mxu1  ;;  %v3522_v30 = vld [vmem:[#allocation36_spill] sm:$0xff] }
 0x1a8   :  { %2006 = vst [vmem:[%s3432_s3 + $0x128] sm:$0xff] %v1956_v50  ;;  %v1852_v18 = vmax.f32 %v1752_v58, %v1802_v56  ;;  %v1753_v40 = vmax.f32 %v3512_v19, %v2347_v48  ;;  %v1803_v41 = vmax.f32 %v3513_v37, %v2447_v49  ;;  %v1268_v42 = vpop.f32.mrb[91].mxu0  ;;  %v1668_v8 = vpop.f32.mrb[91].mxu1  ;;  %v3525_v49 = vld [vmem:[#allocation49_spill] sm:$0xff] }
 0x1a9   :  { %2004 = vst [vmem:[%s3432_s3 + $0x118] sm:$0xff] %v1954_v57  ;;  %v1850_v9 = vmax.f32 %v1750_v51, %v1800_v35  ;;  %v1751_v7 = vmax.f32 %v3514_v6, %v1268_v42  ;;  %v1801_v33 = vmax.f32 %v3515_v47, %v1668_v8  ;;  %v3524_v35 = vld [vmem:[#allocation48_spill] sm:$0xff]  ;;  %v3527_v8 = vld [vmem:[#allocation41_spill] sm:$0xff] }
 0x1aa   :  { %v1909_v36 = vadd.f32 %v3125_v39, %v1852_v18  ;;  %v1853_v60 = vmax.f32 %v1753_v40, %v1803_v41  ;;  %v3526_v41 = vld [vmem:[#allocation40_spill] sm:$0xff] }
 0x1ab   :  { %v1907_v61 = vadd.f32 %v3125_v39, %v1850_v9  ;;  %v1851_v54 = vmax.f32 %v1751_v7, %v1801_v33 }
 0x1ac   :  { %v1959_v22 = vmax.f32 %v1909_v36, 0.0  ;;  %v1910_v23 = vadd.f32 %v3125_v39, %v1853_v60  ;;  %v3528_v36 = vld [vmem:[#allocation50_spill] sm:$0xff] }
 0x1ad   :  { %v1957_v62 = vmax.f32 %v1907_v61, 0.0  ;;  %v1908_v63 = vadd.f32 %v3125_v39, %v1851_v54  ;;  %v2350_v46 = vpop.f32.mrb[92].mxu0  ;;  %v2450_v12 = vpop.f32.mrb[92].mxu1 }
 0x1ae   :  { %2009 = vst [vmem:[%s3432_s3 + $0x140] sm:$0xff] %v1959_v22  ;;  %v1960_v13 = vmax.f32 %v1910_v23, 0.0  ;;  %v1756_v10 = vmax.f32 %v3516_v38, %v2350_v46  ;;  %v1806_v55 = vmax.f32 %v3517_v11, %v2450_v12  ;;  %v1281_v52 = vpop.f32.mrb[93].mxu0  ;;  %v1681_v26 = vpop.f32.mrb[93].mxu1  ;;  %v3529_v23 = vld [vmem:[#allocation44_spill] sm:$0xff] }
 0x1af   :  { %2007 = vst [vmem:[%s3432_s3 + $0x130] sm:$0xff] %v1957_v62  ;;  %v1958_v27 = vmax.f32 %v1908_v63, 0.0  ;;  %v1754_v24 = vmax.f32 %v3518_v53, %v1281_v52  ;;  %v1804_v1 = vmax.f32 %v3519_v0, %v1681_v26  ;;  %v2351_v16 = vpop.f32.mrb[94].mxu0  ;;  %v2451_v17 = vpop.f32.mrb[94].mxu1  ;;  %v3530_v63 = vld [vmem:[#allocation45_spill] sm:$0xff] }
 0x1b0   :  { %2010 = vst [vmem:[%s3432_s3 + $0x148] sm:$0xff] %v1960_v13  ;;  %v1856_v44 = vmax.f32 %v1756_v10, %v1806_v55  ;;  %v1757_v43 = vmax.f32 %v3520_v45, %v2351_v16  ;;  %v1807_v2 = vmax.f32 %v3521_v28, %v2451_v17  ;;  %v1284_v3 = vpop.f32.mrb[95].mxu0  ;;  %v1684_v32 = vpop.f32.mrb[95].mxu1 }
 0x1b1   :  { %2008 = vst [vmem:[%s3432_s3 + $0x138] sm:$0xff] %v1958_v27  ;;  %v1854_v29 = vmax.f32 %v1754_v24, %v1804_v1  ;;  %v1755_v31 = vmax.f32 %v3522_v30, %v1284_v3  ;;  %v1805_v15 = vmax.f32 %v3523_v14, %v1684_v32 }
 0x1b2   :  { %v1913_v50 = vadd.f32 %v3125_v39, %v1856_v44  ;;  %v1857_v20 = vmax.f32 %v1757_v43, %v1807_v2 }
 0x1b3   :  { %v1911_v58 = vadd.f32 %v3125_v39, %v1854_v29  ;;  %v1855_v21 = vmax.f32 %v1755_v31, %v1805_v15 }
 0x1b4   :  { %v1963_v56 = vmax.f32 %v1913_v50, 0.0  ;;  %v1914_v4 = vadd.f32 %v3125_v39, %v1857_v20 }
 0x1b5   :  { %v1961_v5 = vmax.f32 %v1911_v58, 0.0  ;;  %v1912_v57 = vadd.f32 %v3125_v39, %v1855_v21  ;;  %v2354_v59 = vpop.f32.mrb[96].mxu0  ;;  %v2454_v51 = vpop.f32.mrb[96].mxu1 }
 0x1b6   :  { %2013 = vst [vmem:[%s3432_s3 + $0x160] sm:$0xff] %v1963_v56  ;;  %v1964_v34 = vmax.f32 %v1914_v4, 0.0  ;;  %v1760_v48 = vmax.f32 %v3524_v35, %v2354_v59  ;;  %v1810_v18 = vmax.f32 %v3525_v49, %v2454_v51  ;;  %v1297_v19 = vpop.f32.mrb[97].mxu0  ;;  %v1697_v40 = vpop.f32.mrb[97].mxu1 }
 0x1b7   :  { %2011 = vst [vmem:[%s3432_s3 + $0x150] sm:$0xff] %v1961_v5  ;;  %v1962_v37 = vmax.f32 %v1912_v57, 0.0  ;;  %v1758_v42 = vmax.f32 %v3526_v41, %v1297_v19  ;;  %v1808_v9 = vmax.f32 %v3527_v8, %v1697_v40  ;;  %v2355_v6 = vpop.f32.mrb[98].mxu0  ;;  %v2455_v7 = vpop.f32.mrb[98].mxu1 }
 0x1b8   :  { %2014 = vst [vmem:[%s3432_s3 + $0x168] sm:$0xff] %v1964_v34  ;;  %v1860_v47 = vmax.f32 %v1760_v48, %v1810_v18  ;;  %v1761_v33 = vmax.f32 %v3129_v25, %v2355_v6  ;;  %v1811_v60 = vmax.f32 %v3528_v36, %v2455_v7  ;;  %v1300_v61 = vpop.f32.mrb[99].mxu0  ;;  %v1700_v54 = vpop.f32.mrb[99].mxu1 }
 0x1b9   :  { %2012 = vst [vmem:[%s3432_s3 + $0x158] sm:$0xff] %v1962_v37  ;;  %v1858_v22 = vmax.f32 %v1758_v42, %v1808_v9  ;;  %v1759_v62 = vmax.f32 %v3529_v23, %v1300_v61  ;;  %v1809_v46 = vmax.f32 %v3530_v63, %v1700_v54 }
 0x1ba   :  { %v1917_v12 = vadd.f32 %v3125_v39, %v1860_v47  ;;  %v1861_v13 = vmax.f32 %v1761_v33, %v1811_v60 }
 0x1bb   :  { %v1915_v38 = vadd.f32 %v3125_v39, %v1858_v22  ;;  %v1859_v10 = vmax.f32 %v1759_v62, %v1809_v46 }
 0x1bc   :  { %v1967_v25 = vmax.f32 %v1917_v12, 0.0  ;;  %v1918_v11 = vadd.f32 %v3125_v39, %v1861_v13 }
 0x1bd   :  { %v1965_v55 = vmax.f32 %v1915_v38, 0.0  ;;  %v1916_v52 = vadd.f32 %v3125_v39, %v1859_v10 }
 0x1be   :  { %2017 = vst [vmem:[%s3432_s3 + $0x180] sm:$0xff] %v1967_v25  ;;  %v1968_v26 = vmax.f32 %v1918_v11, 0.0 }
 0x1bf   :  { %2015 = vst [vmem:[%s3432_s3 + $0x170] sm:$0xff] %v1965_v55  ;;  %v1966_v27 = vmax.f32 %v1916_v52, 0.0 }
 0x1c0   :  { %2018 = vst [vmem:[%s3432_s3 + $0x188] sm:$0xff] %v1968_v26 }
 0x1c1   :  { %2016 = vst [vmem:[%s3432_s3 + $0x178] sm:$0xff] %v1966_v27 }

// kernel: net_forward.4
= control target key start
LH: loop header
LB: loop body
LE: loop exit
PB: predicated region body
PF: predicated region fallthrough
CT: control target
= control target key end

     0   :  { %s1033_s1 = inlined_call_operand.vmem [shape: bf16[256,128], index: 1, kind: input, shape index: {}]   ;;  %s1034_s0 = inlined_call_operand.vmem [shape: bf16[4,64,256], index: 0, kind: input, shape index: {}]   ;;  %s1035_s2 = inlined_call_operand.vmem [shape: f32[1,128], index: 2, kind: input, shape index: {}]   ;;  %s1036_s3 = inlined_call_operand.vmem [shape: f32[64,128], index: 3, kind: output, shape index: {}]  }
   0x1   :  { %v732_v0 = vld [vmem:[%s1033_s1 + $0x40] sm:$0xff]   ;;  %v734_v2 = vld [vmem:[%s1033_s1 + $0x48] sm:$0xff]   ;;  %v736_v4 = vld [vmem:[%s1033_s1 + $0x50] sm:$0xff]  }
   0x2   :  { %v733_v1 = vld [vmem:[%s1033_s1] sm:$0xff]   ;;  %604 = vmatprep.subr.bf16.mxu0 %v732_v0  ;;  %716 = vmatprep.subr.bf16.mxu1 %v732_v0  ;;  %v735_v3 = vld [vmem:[%s1033_s1 + $0x8] sm:$0xff]   ;;  %v737_v5 = vld [vmem:[%s1033_s1 + $0x10] sm:$0xff]  }
   0x3   :  { %605 = vmatpush3.bf16.msra.mxu0 %v733_v1  ;;  %724 = vmatpush3.bf16.msra.mxu1 %v733_v1  ;;  %v738_v6 = vld [vmem:[%s1033_s1 + $0x58] sm:$0xff]   ;;  %v740_v8 = vld [vmem:[%s1033_s1 + $0x60] sm:$0xff]   ;;  %v742_v10 = vld [vmem:[%s1033_s1 + $0x68] sm:$0xff]  }
   0x4   :  { %606 = vmatprep.subr.bf16.mxu0 %v734_v2  ;;  %717 = vmatprep.subr.bf16.mxu1 %v734_v2  ;;  %v739_v7 = vld [vmem:[%s1033_s1 + $0x18] sm:$0xff]   ;;  %v741_v9 = vld [vmem:[%s1033_s1 + $0x20] sm:$0xff]   ;;  %v743_v13 = vld [vmem:[%s1033_s1 + $0x28] sm:$0xff]  }
   0x5   :  { %v750_v11 = vld [vmem:[%s1034_s0 + $0x4] ss:$8 sps:$4 sm:$0xff]   ;;  %v744_v14 = vld [vmem:[%s1033_s1 + $0x70] sm:$0xff]   ;;  %v746_v16 = vld [vmem:[%s1033_s1 + $0x78] sm:$0xff]  }
   0x6   :  { %v753_v12 = vld [vmem:[%s1034_s0 + $0x84] ss:$8 sps:$4 sm:$0xff]   ;;  %367 = vmatprep.mubr.bf16.mxu0 %v750_v11  ;;  %v745_v15 = vld [vmem:[%s1033_s1 + $0x30] sm:$0xff]   ;;  %v747_v17 = vld [vmem:[%s1033_s1 + $0x38] sm:$0xff]  }
   0x7   :  { %607 = vmatpush3.bf16.msra.mxu0 %v735_v3  ;;  %725 = vmatpush3.bf16.msra.mxu1 %v735_v3  ;;  %v748_v18 = vld [vmem:[%s1034_s0] ss:$8 sps:$4 sm:$0xff]   ;;  %v754_v20 = vld [vmem:[%s1034_s0 + $0x14] ss:$8 sps:$4 sm:$0xff]   ;;  %v758_v22 = vld [vmem:[%s1034_s0 + $0x10] ss:$8 sps:$4 sm:$0xff]  }
   0x8   :  { %608 = vmatprep.subr.bf16.mxu0 %v736_v4  ;;  %718 = vmatprep.subr.bf16.mxu1 %v736_v4  ;;  %v751_v19 = vld [vmem:[%s1034_s0 + $0x80] ss:$8 sps:$4 sm:$0xff]   ;;  %v756_v21 = vld [vmem:[%s1034_s0 + $0x94] ss:$8 sps:$4 sm:$0xff]   ;;  %v759_v23 = vld [vmem:[%s1034_s0 + $0x90] ss:$8 sps:$4 sm:$0xff]  }
   0x9   :  { %431 = vmatprep.mubr.bf16.mxu1 %v753_v12  ;;  %v760_v24 = vld [vmem:[%s1034_s0 + $0x24] ss:$8 sps:$4 sm:$0xff]   ;;  %v764_v26 = vld [vmem:[%s1034_s0 + $0x20] ss:$8 sps:$4 sm:$0xff]   ;;  %v766_v28 = vld [vmem:[%s1034_s0 + $0x34] ss:$8 sps:$4 sm:$0xff]  }
   0xa   :  { %v762_v25 = vld [vmem:[%s1034_s0 + $0xa4] ss:$8 sps:$4 sm:$0xff]   ;;  %v765_v27 = vld [vmem:[%s1034_s0 + $0xa0] ss:$8 sps:$4 sm:$0xff]   ;;  %v768_v29 = vld [vmem:[%s1034_s0 + $0xb4] ss:$8 sps:$4 sm:$0xff]  }
   0xb   :  { %609 = vmatpush3.bf16.msra.mxu0 %v737_v5  ;;  %726 = vmatpush3.bf16.msra.mxu1 %v737_v5  ;;  %v770_v30 = vld [vmem:[%s1034_s0 + $0x30] ss:$8 sps:$4 sm:$0xff]   ;;  %v772_v32 = vld [vmem:[%s1034_s0 + $0x44] ss:$8 sps:$4 sm:$0xff]   ;;  %v776_v34 = vld [vmem:[%s1034_s0 + $0x40] ss:$8 sps:$4 sm:$0xff]  }
   0xc   :  { %610 = vmatprep.subr.bf16.mxu0 %v738_v6  ;;  %719 = vmatprep.subr.bf16.mxu1 %v738_v6  ;;  %v771_v31 = vld [vmem:[%s1034_s0 + $0xb0] ss:$8 sps:$4 sm:$0xff]   ;;  %v774_v33 = vld [vmem:[%s1034_s0 + $0xc4] ss:$8 sps:$4 sm:$0xff]   ;;  %v777_v35 = vld [vmem:[%s1034_s0 + $0xc0] ss:$8 sps:$4 sm:$0xff]  }
   0xd   :  { %v778_v36 = vld [vmem:[%s1034_s0 + $0x54] ss:$8 sps:$4 sm:$0xff]   ;;  %v782_v38 = vld [vmem:[%s1034_s0 + $0x50] ss:$8 sps:$4 sm:$0xff]   ;;  %v784_v40 = vld [vmem:[%s1034_s0 + $0x64] ss:$8 sps:$4 sm:$0xff]  }
   0xe   :  { %v780_v37 = vld [vmem:[%s1034_s0 + $0xd4] ss:$8 sps:$4 sm:$0xff]   ;;  %v783_v39 = vld [vmem:[%s1034_s0 + $0xd0] ss:$8 sps:$4 sm:$0xff]   ;;  %v786_v41 = vld [vmem:[%s1034_s0 + $0xe4] ss:$8 sps:$4 sm:$0xff]  }
   0xf   :  { %611 = vmatpush3.bf16.msra.mxu0 %v739_v7  ;;  %727 = vmatpush3.bf16.msra.mxu1 %v739_v7  ;;  %v788_v42 = vld [vmem:[%s1034_s0 + $0x60] ss:$8 sps:$4 sm:$0xff]   ;;  %v790_v44 = vld [vmem:[%s1034_s0 + $0x74] ss:$8 sps:$4 sm:$0xff]   ;;  %v794_v46 = vld [vmem:[%s1034_s0 + $0x70] ss:$8 sps:$4 sm:$0xff]  }
  0x10   :  { %612 = vmatprep.subr.bf16.mxu0 %v740_v8  ;;  %720 = vmatprep.subr.bf16.mxu1 %v740_v8  ;;  %v789_v43 = vld [vmem:[%s1034_s0 + $0xe0] ss:$8 sps:$4 sm:$0xff]   ;;  %v792_v45 = vld [vmem:[%s1034_s0 + $0xf4] ss:$8 sps:$4 sm:$0xff]   ;;  %v795_v47 = vld [vmem:[%s1034_s0 + $0xf0] ss:$8 sps:$4 sm:$0xff]  }
  0x13   :  { %613 = vmatpush3.bf16.msra.mxu0 %v741_v9  ;;  %728 = vmatpush3.bf16.msra.mxu1 %v741_v9 }
  0x14   :  { %614 = vmatprep.subr.bf16.mxu0 %v742_v10  ;;  %721 = vmatprep.subr.bf16.mxu1 %v742_v10 }
  0x17   :  { %615 = vmatpush3.bf16.msra.mxu0 %v743_v13  ;;  %729 = vmatpush3.bf16.msra.mxu1 %v743_v13 }
  0x18   :  { %616 = vmatprep.subr.bf16.mxu0 %v744_v14  ;;  %722 = vmatprep.subr.bf16.mxu1 %v744_v14 }
  0x1b   :  { %617 = vmatpush3.bf16.msra.mxu0 %v745_v15  ;;  %730 = vmatpush3.bf16.msra.mxu1 %v745_v15 }
  0x1c   :  { %618 = vmatprep.subr.bf16.mxu0 %v746_v16  ;;  %723 = vmatprep.subr.bf16.mxu1 %v746_v16 }
  0x1f   :  { %619 = vmatpush3.bf16.msra.mxu0 %v747_v17  ;;  %731 = vmatpush3.bf16.msra.mxu1 %v747_v17 }
  0x22   :  { %368 = vmatmul.mubr.bf16.vlgmr.msra.gmra.mrb[0].mxu0 %v748_v18  ;;  %432 = vmatmul.mubr.bf16.vlgmr.msra.gmra.mrb[0].mxu1 %v751_v19 }
  0x23   :  { %375 = vmatprep.mubr.bf16.mxu0 %v754_v20  ;;  %439 = vmatprep.mubr.bf16.mxu1 %v756_v21 }
  0x2a   :  { %376 = vmatmul.mubr.bf16.gmra.mrb[4].mxu0 %v758_v22  ;;  %440 = vmatmul.mubr.bf16.gmra.mrb[4].mxu1 %v759_v23 }
  0x2b   :  { %383 = vmatprep.mubr.bf16.mxu0 %v760_v24  ;;  %447 = vmatprep.mubr.bf16.mxu1 %v762_v25 }
  0x32   :  { %384 = vmatmul.mubr.bf16.gmra.mrb[8].mxu0 %v764_v26  ;;  %448 = vmatmul.mubr.bf16.gmra.mrb[8].mxu1 %v765_v27 }
  0x33   :  { %391 = vmatprep.mubr.bf16.mxu0 %v766_v28  ;;  %455 = vmatprep.mubr.bf16.mxu1 %v768_v29 }
  0x3a   :  { %392 = vmatmul.mubr.bf16.gmra.mrb[12].mxu0 %v770_v30  ;;  %456 = vmatmul.mubr.bf16.gmra.mrb[12].mxu1 %v771_v31 }
  0x3b   :  { %399 = vmatprep.mubr.bf16.mxu0 %v772_v32  ;;  %463 = vmatprep.mubr.bf16.mxu1 %v774_v33 }
  0x42   :  { %400 = vmatmul.mubr.bf16.gmra.mrb[16].mxu0 %v776_v34  ;;  %464 = vmatmul.mubr.bf16.gmra.mrb[16].mxu1 %v777_v35 }
  0x43   :  { %407 = vmatprep.mubr.bf16.mxu0 %v778_v36  ;;  %471 = vmatprep.mubr.bf16.mxu1 %v780_v37 }
  0x4a   :  { %408 = vmatmul.mubr.bf16.gmra.mrb[20].mxu0 %v782_v38  ;;  %472 = vmatmul.mubr.bf16.gmra.mrb[20].mxu1 %v783_v39 }
  0x4b   :  { %415 = vmatprep.mubr.bf16.mxu0 %v784_v40  ;;  %479 = vmatprep.mubr.bf16.mxu1 %v786_v41 }
  0x52   :  { %416 = vmatmul.mubr.bf16.gmra.mrb[24].mxu0 %v788_v42  ;;  %480 = vmatmul.mubr.bf16.gmra.mrb[24].mxu1 %v789_v43 }
  0x53   :  { %423 = vmatprep.mubr.bf16.mxu0 %v790_v44  ;;  %487 = vmatprep.mubr.bf16.mxu1 %v792_v45 }
  0x5a   :  { %424 = vmatmul.mubr.bf16.gmra.mrb[28].mxu0 %v794_v46  ;;  %488 = vmatmul.mubr.bf16.gmra.mrb[28].mxu1 %v795_v47  ;;  %v987_v46 = vld [vmem:[%s1035_s2] ss:$0 sm:$0xff] }
  0xf5   :  { %v620_v48 = vpop.f32.mrb[0].mxu0  ;;  %v668_v49 = vpop.f32.mrb[0].mxu1 }
  0xf6   :  { %v621_v50 = vpop.f32.mrb[1].mxu0  ;;  %v669_v51 = vpop.f32.mrb[1].mxu1 }
  0xf7   :  { %v622_v52 = vadd.f32 %v621_v50, %v620_v48  ;;  %v670_v53 = vadd.f32 %v669_v51, %v668_v49  ;;  %v623_v54 = vpop.f32.mrb[2].mxu0  ;;  %v671_v55 = vpop.f32.mrb[2].mxu1 }
  0xf8   :  { %v624_v56 = vpop.f32.mrb[3].mxu0  ;;  %v672_v57 = vpop.f32.mrb[3].mxu1 }
  0xf9   :  { %v625_v58 = vadd.f32 %v624_v56, %v623_v54  ;;  %v673_v59 = vadd.f32 %v672_v57, %v671_v55 }
  0xfd   :  { %v626_v60 = vpop.f32.mrb[4].mxu0  ;;  %v674_v61 = vpop.f32.mrb[4].mxu1 }
  0xfe   :  { %v627_v62 = vpop.f32.mrb[5].mxu0  ;;  %v675_v63 = vpop.f32.mrb[5].mxu1 }
  0xff   :  { %v960_v0 = vadd.f32 %v627_v62, %v626_v60  ;;  %v962_v1 = vadd.f32 %v675_v63, %v674_v61  ;;  %v629_v2 = vpop.f32.mrb[6].mxu0  ;;  %v677_v3 = vpop.f32.mrb[6].mxu1 }
 0x100   :  { %v630_v4 = vpop.f32.mrb[7].mxu0  ;;  %v678_v5 = vpop.f32.mrb[7].mxu1 }
 0x101   :  { %v964_v6 = vadd.f32 %v630_v4, %v629_v2  ;;  %v966_v7 = vadd.f32 %v678_v5, %v677_v3 }
 0x105   :  { %v632_v8 = vpop.f32.mrb[8].mxu0  ;;  %v680_v9 = vpop.f32.mrb[8].mxu1 }
 0x106   :  { %v633_v10 = vpop.f32.mrb[9].mxu0  ;;  %v681_v11 = vpop.f32.mrb[9].mxu1 }
 0x107   :  { %v968_v12 = vadd.f32 %v633_v10, %v632_v8  ;;  %v970_v13 = vadd.f32 %v681_v11, %v680_v9  ;;  %v635_v14 = vpop.f32.mrb[10].mxu0  ;;  %v683_v15 = vpop.f32.mrb[10].mxu1 }
 0x108   :  { %v636_v16 = vpop.f32.mrb[11].mxu0  ;;  %v684_v17 = vpop.f32.mrb[11].mxu1 }
 0x109   :  { %v972_v18 = vadd.f32 %v636_v16, %v635_v14  ;;  %v974_v19 = vadd.f32 %v684_v17, %v683_v15 }
 0x10d   :  { %v638_v20 = vpop.f32.mrb[12].mxu0  ;;  %v686_v21 = vpop.f32.mrb[12].mxu1 }
 0x10e   :  { %v639_v22 = vpop.f32.mrb[13].mxu0  ;;  %v687_v23 = vpop.f32.mrb[13].mxu1 }
 0x10f   :  { %v976_v24 = vadd.f32 %v639_v22, %v638_v20  ;;  %v978_v25 = vadd.f32 %v687_v23, %v686_v21  ;;  %v641_v26 = vpop.f32.mrb[14].mxu0  ;;  %v689_v27 = vpop.f32.mrb[14].mxu1 }
 0x110   :  { %v642_v28 = vpop.f32.mrb[15].mxu0  ;;  %v690_v29 = vpop.f32.mrb[15].mxu1 }
 0x111   :  { %v980_v30 = vadd.f32 %v642_v28, %v641_v26  ;;  %v982_v31 = vadd.f32 %v690_v29, %v689_v27 }
 0x115   :  { %v644_v32 = vpop.f32.mrb[16].mxu0  ;;  %v692_v33 = vpop.f32.mrb[16].mxu1 }
 0x116   :  { %v645_v34 = vpop.f32.mrb[17].mxu0  ;;  %v693_v35 = vpop.f32.mrb[17].mxu1 }
 0x117   :  { %v646_v36 = vadd.f32 %v645_v34, %v644_v32  ;;  %v694_v37 = vadd.f32 %v693_v35, %v692_v33  ;;  %v647_v38 = vpop.f32.mrb[18].mxu0  ;;  %v695_v39 = vpop.f32.mrb[18].mxu1 }
 0x118   :  { %v648_v40 = vpop.f32.mrb[19].mxu0  ;;  %v696_v41 = vpop.f32.mrb[19].mxu1 }
 0x119   :  { %v496_v42 = vmax.f32 %v622_v52, %v646_v36  ;;  %v504_v43 = vmax.f32 %v670_v53, %v694_v37  ;;  %v649_v44 = vadd.f32 %v648_v40, %v647_v38  ;;  %v697_v45 = vadd.f32 %v696_v41, %v695_v39 }
 0x11b   :  { %v512_v47 = vmax.f32 %v496_v42, %v504_v43  ;;  %v497_v48 = vmax.f32 %v625_v58, %v649_v44  ;;  %v505_v49 = vmax.f32 %v673_v59, %v697_v45 }
 0x11d   :  { %v527_v50 = vadd.f32 %v987_v46, %v512_v47  ;;  %v513_v51 = vmax.f32 %v497_v48, %v505_v49  ;;  %v650_v54 = vpop.f32.mrb[20].mxu0  ;;  %v698_v55 = vpop.f32.mrb[20].mxu1 }
 0x11e   :  { %v651_v56 = vpop.f32.mrb[21].mxu0  ;;  %v699_v57 = vpop.f32.mrb[21].mxu1 }
 0x11f   :  { %v535_v60 = vmax.f32 %v527_v50, 0.0  ;;  %v528_v52 = vadd.f32 %v987_v46, %v513_v51  ;;  %v652_v53 = vadd.f32 %v651_v56, %v650_v54  ;;  %v700_v61 = vadd.f32 %v699_v57, %v698_v55  ;;  %v653_v62 = vpop.f32.mrb[22].mxu0  ;;  %v701_v63 = vpop.f32.mrb[22].mxu1 }
 0x120   :  { %v654_v2 = vpop.f32.mrb[23].mxu0  ;;  %v702_v3 = vpop.f32.mrb[23].mxu1 }
 0x121   :  { %543 = vst [vmem:[%s1036_s3] sm:$0xff] %v535_v60  ;;  %v536_v58 = vmax.f32 %v528_v52, 0.0  ;;  %v498_v59 = vmax.f32 %v960_v0, %v652_v53  ;;  %v506_v4 = vmax.f32 %v962_v1, %v700_v61  ;;  %v655_v5 = vadd.f32 %v654_v2, %v653_v62 }
 0x122   :  { %v703_v8 = vadd.f32 %v702_v3, %v701_v63 }
 0x123   :  { %544 = vst [vmem:[%s1036_s3 + $0x8] sm:$0xff] %v536_v58  ;;  %v514_v9 = vmax.f32 %v498_v59, %v506_v4  ;;  %v499_v10 = vmax.f32 %v964_v6, %v655_v5 }
 0x124   :  { %v507_v11 = vmax.f32 %v966_v7, %v703_v8 }
 0x125   :  { %v529_v14 = vadd.f32 %v987_v46, %v514_v9  ;;  %v656_v15 = vpop.f32.mrb[24].mxu0  ;;  %v704_v16 = vpop.f32.mrb[24].mxu1 }
 0x126   :  { %v515_v17 = vmax.f32 %v499_v10, %v507_v11  ;;  %v657_v20 = vpop.f32.mrb[25].mxu0  ;;  %v705_v0 = vpop.f32.mrb[25].mxu1 }
 0x127   :  { %v537_v21 = vmax.f32 %v529_v14, 0.0  ;;  %v658_v1 = vadd.f32 %v657_v20, %v656_v15  ;;  %v706_v22 = vadd.f32 %v705_v0, %v704_v16  ;;  %v659_v23 = vpop.f32.mrb[26].mxu0  ;;  %v707_v26 = vpop.f32.mrb[26].mxu1 }
 0x128   :  { %v530_v27 = vadd.f32 %v987_v46, %v515_v17  ;;  %v660_v28 = vpop.f32.mrb[27].mxu0  ;;  %v708_v29 = vpop.f32.mrb[27].mxu1 }
 0x129   :  { %545 = vst [vmem:[%s1036_s3 + $0x10] sm:$0xff] %v537_v21  ;;  %v500_v6 = vmax.f32 %v968_v12, %v658_v1  ;;  %v508_v7 = vmax.f32 %v970_v13, %v706_v22  ;;  %v661_v32 = vadd.f32 %v660_v28, %v659_v23  ;;  %v709_v33 = vadd.f32 %v708_v29, %v707_v26 }
 0x12a   :  { %v538_v34 = vmax.f32 %v530_v27, 0.0 }
 0x12b   :  { %v516_v35 = vmax.f32 %v500_v6, %v508_v7  ;;  %v501_v36 = vmax.f32 %v972_v18, %v661_v32  ;;  %v509_v37 = vmax.f32 %v974_v19, %v709_v33 }
 0x12c   :  { %546 = vst [vmem:[%s1036_s3 + $0x18] sm:$0xff] %v538_v34 }
 0x12d   :  { %v531_v38 = vadd.f32 %v987_v46, %v516_v35  ;;  %v517_v39 = vmax.f32 %v501_v36, %v509_v37  ;;  %v662_v40 = vpop.f32.mrb[28].mxu0  ;;  %v710_v41 = vpop.f32.mrb[28].mxu1 }
 0x12e   :  { %v663_v12 = vpop.f32.mrb[29].mxu0  ;;  %v711_v42 = vpop.f32.mrb[29].mxu1 }
 0x12f   :  { %v539_v13 = vmax.f32 %v531_v38, 0.0  ;;  %v532_v43 = vadd.f32 %v987_v46, %v517_v39  ;;  %v664_v44 = vadd.f32 %v663_v12, %v662_v40  ;;  %v712_v45 = vadd.f32 %v711_v42, %v710_v41  ;;  %v665_v47 = vpop.f32.mrb[30].mxu0  ;;  %v713_v18 = vpop.f32.mrb[30].mxu1 }
 0x130   :  { %v666_v48 = vpop.f32.mrb[31].mxu0  ;;  %v714_v19 = vpop.f32.mrb[31].mxu1 }
 0x131   :  { %547 = vst [vmem:[%s1036_s3 + $0x20] sm:$0xff] %v539_v13  ;;  %v540_v49 = vmax.f32 %v532_v43, 0.0  ;;  %v502_v50 = vmax.f32 %v976_v24, %v664_v44  ;;  %v510_v51 = vmax.f32 %v978_v25, %v712_v45  ;;  %v667_v54 = vadd.f32 %v666_v48, %v665_v47 }
 0x132   :  { %v715_v55 = vadd.f32 %v714_v19, %v713_v18 }
 0x133   :  { %548 = vst [vmem:[%s1036_s3 + $0x28] sm:$0xff] %v540_v49  ;;  %v518_v56 = vmax.f32 %v502_v50, %v510_v51  ;;  %v503_v57 = vmax.f32 %v980_v30, %v667_v54 }
 0x134   :  { %v511_v60 = vmax.f32 %v982_v31, %v715_v55 }
 0x135   :  { %v533_v52 = vadd.f32 %v987_v46, %v518_v56 }
 0x136   :  { %v519_v53 = vmax.f32 %v503_v57, %v511_v60 }
 0x137   :  { %v541_v61 = vmax.f32 %v533_v52, 0.0 }
 0x138   :  { %v534_v62 = vadd.f32 %v987_v46, %v519_v53 }
 0x139   :  { %549 = vst [vmem:[%s1036_s3 + $0x30] sm:$0xff] %v541_v61 }
 0x13a   :  { %v542_v24 = vmax.f32 %v534_v62, 0.0 }
 0x13c   :  { %550 = vst [vmem:[%s1036_s3 + $0x38] sm:$0xff] %v542_v24 }

// kernel: net_forward.5
= control target key start
LH: loop header
LB: loop body
LE: loop exit
PB: predicated region body
PF: predicated region fallthrough
CT: control target
= control target key end

     0   :  { %v845_v34 = vmov 0.0   ;;  %vm846_vm0 = vmmov 0   ;;  %s1076_s1 = inlined_call_operand.vmem [shape: bf16[512,128], index: 1, kind: input, shape index: {}]   ;;  %s1077_s0 = inlined_call_operand.vmem [shape: bf16[16,512], index: 0, kind: input, shape index: {}]   ;;  %s1078_s3 = inlined_call_operand.vmem [shape: bf16[128,128], index: 3, kind: input, shape index: {}]   ;;  %s1079_s5 = inlined_call_operand.vmem [shape: bf16[128,128], index: 5, kind: input, shape index: {}]   ;;  %s1080_s2 = inlined_call_operand.vmem [shape: f32[1,128], index: 2, kind: input, shape index: {}]   ;;  %s1081_s4 = inlined_call_operand.vmem [shape: f32[1,128], index: 4, kind: input, shape index: {}]   ;;  %s1082_s6 = inlined_call_operand.vmem [shape: f32[1,128], index: 6, kind: input, shape index: {}]   ;;  %s1083_s7 = inlined_call_operand.vmem [shape: f32[16,128], index: 7, kind: output, shape index: {}]  }
   0x1   :  { %v791_v0 = vld [vmem:[%s1076_s1 + $0x40] sm:$0xff]   ;;  %v795_v4 = vld [vmem:[%s1076_s1 + $0x48] sm:$0xff]   ;;  %v799_v8 = vld [vmem:[%s1076_s1 + $0x50] sm:$0xff]  }
   0x2   :  { %v792_v1 = vld [vmem:[%s1076_s1 + $0xc0] sm:$0xff]   ;;  %687 = vmatprep.subr.bf16.mxu0 %v791_v0  ;;  %v796_v5 = vld [vmem:[%s1076_s1 + $0xc8] sm:$0xff]   ;;  %v800_v9 = vld [vmem:[%s1076_s1 + $0xd0] sm:$0xff]  }
   0x3   :  { %v793_v2 = vld [vmem:[%s1076_s1] sm:$0xff]   ;;  %709 = vmatprep.subr.bf16.mxu1 %v792_v1  ;;  %v797_v6 = vld [vmem:[%s1076_s1 + $0x8] sm:$0xff]   ;;  %v801_v10 = vld [vmem:[%s1076_s1 + $0x10] sm:$0xff]  }
   0x4   :  { %v794_v3 = vld [vmem:[%s1076_s1 + $0x80] sm:$0xff]   ;;  %688 = vmatpush3.bf16.msra.mxu0 %v793_v2  ;;  %v798_v7 = vld [vmem:[%s1076_s1 + $0x88] sm:$0xff]   ;;  %v802_v11 = vld [vmem:[%s1076_s1 + $0x90] sm:$0xff]  }
   0x5   :  { %710 = vmatpush3.bf16.msra.mxu1 %v794_v3  ;;  %689 = vmatprep.subr.bf16.mxu0 %v795_v4  ;;  %v803_v12 = vld [vmem:[%s1076_s1 + $0x58] sm:$0xff]   ;;  %v807_v16 = vld [vmem:[%s1076_s1 + $0x60] sm:$0xff]   ;;  %v811_v20 = vld [vmem:[%s1076_s1 + $0x68] sm:$0xff]  }
   0x6   :  { %711 = vmatprep.subr.bf16.mxu1 %v796_v5  ;;  %v804_v13 = vld [vmem:[%s1076_s1 + $0xd8] sm:$0xff]   ;;  %v808_v17 = vld [vmem:[%s1076_s1 + $0xe0] sm:$0xff]   ;;  %v812_v21 = vld [vmem:[%s1076_s1 + $0xe8] sm:$0xff]  }
   0x7   :  { %v805_v14 = vld [vmem:[%s1076_s1 + $0x18] sm:$0xff]   ;;  %v809_v18 = vld [vmem:[%s1076_s1 + $0x20] sm:$0xff]   ;;  %v813_v22 = vld [vmem:[%s1076_s1 + $0x28] sm:$0xff]  }
   0x8   :  { %690 = vmatpush3.bf16.msra.mxu0 %v797_v6  ;;  %v806_v15 = vld [vmem:[%s1076_s1 + $0x98] sm:$0xff]   ;;  %v810_v19 = vld [vmem:[%s1076_s1 + $0xa0] sm:$0xff]   ;;  %v814_v23 = vld [vmem:[%s1076_s1 + $0xa8] sm:$0xff]  }
   0x9   :  { %712 = vmatpush3.bf16.msra.mxu1 %v798_v7  ;;  %691 = vmatprep.subr.bf16.mxu0 %v799_v8  ;;  %v815_v24 = vld [vmem:[%s1076_s1 + $0x70] sm:$0xff]   ;;  %v819_v28 = vld [vmem:[%s1076_s1 + $0x78] sm:$0xff]   ;;  %v829_v37 = vld [vmem:[%s1078_s3] sm:$0xff]  }
   0xa   :  { %713 = vmatprep.subr.bf16.mxu1 %v800_v9  ;;  %v816_v25 = vld [vmem:[%s1076_s1 + $0xf0] sm:$0xff]   ;;  %v820_v29 = vld [vmem:[%s1076_s1 + $0xf8] sm:$0xff]   ;;  %v830_v38 = vld [vmem:[%s1078_s3 + $0x8] sm:$0xff]  }
   0xb   :  { %v817_v26 = vld [vmem:[%s1076_s1 + $0x30] sm:$0xff]   ;;  %v821_v30 = vld [vmem:[%s1076_s1 + $0x38] sm:$0xff]   ;;  %v833_v41 = vld [vmem:[%s1078_s3 + $0x20] sm:$0xff]  }
   0xc   :  { %692 = vmatpush3.bf16.msra.mxu0 %v801_v10  ;;  %v818_v27 = vld [vmem:[%s1076_s1 + $0xb0] sm:$0xff]   ;;  %v822_v31 = vld [vmem:[%s1076_s1 + $0xb8] sm:$0xff]   ;;  %v834_v42 = vld [vmem:[%s1078_s3 + $0x28] sm:$0xff]  }
   0xd   :  { %714 = vmatpush3.bf16.msra.mxu1 %v802_v11  ;;  %693 = vmatprep.subr.bf16.mxu0 %v803_v12  ;;  %v823_v32 = vld [vmem:[%s1077_s0] ss:$16 sps:$4 sm:$0xff]   ;;  %v825_v33 = vld [vmem:[%s1077_s0 + $0x4] ss:$16 sps:$4 sm:$0xff]   ;;  %v826_v35 = vld [vmem:[%s1077_s0 + $0x8] ss:$16 sps:$4 sm:$0xff]  }
   0xe   :  { %715 = vmatprep.subr.bf16.mxu1 %v804_v13  ;;  %v828_v36 = vld [vmem:[%s1077_s0 + $0xc] ss:$16 sps:$4 sm:$0xff]   ;;  %346 = vmatprep.mubr.bf16.mxu0 %v825_v33  ;;  %v831_v39 = vld [vmem:[%s1078_s3 + $0x10] sm:$0xff]   ;;  %v837_v45 = vld [vmem:[%s1079_s5] sm:$0xff]  }
   0xf   :  { %387 = vmatprep.mubr.bf16.mxu1 %v828_v36  ;;  %v832_v40 = vld [vmem:[%s1078_s3 + $0x18] sm:$0xff]   ;;  %v835_v43 = vld [vmem:[%s1078_s3 + $0x30] sm:$0xff]   ;;  %v838_v46 = vld [vmem:[%s1079_s5 + $0x8] sm:$0xff]  }
  0x10   :  { %694 = vmatpush3.bf16.msra.mxu0 %v805_v14  ;;  %v836_v44 = vld [vmem:[%s1078_s3 + $0x38] sm:$0xff]   ;;  %v839_v47 = vld [vmem:[%s1079_s5 + $0x10] sm:$0xff]   ;;  %v841_v49 = vld [vmem:[%s1079_s5 + $0x20] sm:$0xff]  }
  0x11   :  { %716 = vmatpush3.bf16.msra.mxu1 %v806_v15  ;;  %695 = vmatprep.subr.bf16.mxu0 %v807_v16  ;;  %v840_v48 = vld [vmem:[%s1079_s5 + $0x18] sm:$0xff]   ;;  %v842_v50 = vld [vmem:[%s1079_s5 + $0x28] sm:$0xff]   ;;  %v632_v53 = vld [vmem:[%s1080_s2] ss:$0 sm:$0xff] }
  0x12   :  { %717 = vmatprep.subr.bf16.mxu1 %v808_v17  ;;  %v843_v7 = vld [vmem:[%s1079_s5 + $0x30] sm:$0xff]   ;;  %v844_v8 = vld [vmem:[%s1079_s5 + $0x38] sm:$0xff]   ;;  %v669_v9 = vld [vmem:[%s1081_s4] ss:$0 sm:$0xff] }
  0x14   :  { %696 = vmatpush3.bf16.msra.mxu0 %v809_v18 }
  0x15   :  { %718 = vmatpush3.bf16.msra.mxu1 %v810_v19  ;;  %697 = vmatprep.subr.bf16.mxu0 %v811_v20  ;;  %v678_v19 = vld [vmem:[%s1082_s6] ss:$0 sm:$0xff] }
  0x16   :  { %719 = vmatprep.subr.bf16.mxu1 %v812_v21 }
  0x18   :  { %698 = vmatpush3.bf16.msra.mxu0 %v813_v22 }
  0x19   :  { %720 = vmatpush3.bf16.msra.mxu1 %v814_v23  ;;  %699 = vmatprep.subr.bf16.mxu0 %v815_v24 }
  0x1a   :  { %721 = vmatprep.subr.bf16.mxu1 %v816_v25 }
  0x1c   :  { %700 = vmatpush3.bf16.msra.mxu0 %v817_v26 }
  0x1d   :  { %722 = vmatpush3.bf16.msra.mxu1 %v818_v27  ;;  %701 = vmatprep.subr.bf16.mxu0 %v819_v28 }
  0x1e   :  { %723 = vmatprep.subr.bf16.mxu1 %v820_v29 }
  0x20   :  { %702 = vmatpush3.bf16.msra.mxu0 %v821_v30 }
  0x21   :  { %724 = vmatpush3.bf16.msra.mxu1 %v822_v31  ;;  %749 = vmatprep.subr.bf16.mxu0 %v845_v34 }
  0x22   :  { %769 = vmatprep.subr.bf16.mxu1 %v845_v34 }
  0x23   :  { %347 = vmatmul.mubr.bf16.vlgmr.msra.gmra.mrb[0].mxu0 %v823_v32 }
  0x24   :  { %388 = vmatmul.mubr.bf16.vlgmr.msra.gmra.mrb[0].mxu1 %v826_v35  ;;  %750 = vmatpush3.bf16.msra.mxu0 %v829_v37 }
  0x25   :  { %751 = vmatprep.subr.bf16.mxu0 %v845_v34  ;;  %765 = vmatprep.mubr.msk.bf16.mxu0 %vm846_vm0, %v845_v34 }
  0x26   :  { %785 = vmatprep.mubr.msk.bf16.mxu1 %vm846_vm0, %v845_v34  ;;  %770 = vmatpush3.bf16.msra.mxu1 %v837_v45 }
  0x27   :  { %771 = vmatprep.subr.bf16.mxu1 %v845_v34 }
  0x28   :  { %752 = vmatpush3.bf16.msra.mxu0 %v830_v38 }
  0x29   :  { %753 = vmatprep.subr.bf16.mxu0 %v845_v34 }
  0x2a   :  { %772 = vmatpush3.bf16.msra.mxu1 %v838_v46 }
  0x2b   :  { %773 = vmatprep.subr.bf16.mxu1 %v845_v34 }
  0x2c   :  { %754 = vmatpush3.bf16.msra.mxu0 %v831_v39 }
  0x2d   :  { %755 = vmatprep.subr.bf16.mxu0 %v845_v34 }
  0x2e   :  { %774 = vmatpush3.bf16.msra.mxu1 %v839_v47 }
  0x2f   :  { %775 = vmatprep.subr.bf16.mxu1 %v845_v34 }
  0x30   :  { %756 = vmatpush3.bf16.msra.mxu0 %v832_v40 }
  0x31   :  { %757 = vmatprep.subr.bf16.mxu0 %v845_v34 }
  0x32   :  { %776 = vmatpush3.bf16.msra.mxu1 %v840_v48 }
  0x33   :  { %777 = vmatprep.subr.bf16.mxu1 %v845_v34 }
  0x34   :  { %758 = vmatpush3.bf16.msra.mxu0 %v833_v41 }
  0x35   :  { %759 = vmatprep.subr.bf16.mxu0 %v845_v34 }
  0x36   :  { %778 = vmatpush3.bf16.msra.mxu1 %v841_v49 }
  0x37   :  { %779 = vmatprep.subr.bf16.mxu1 %v845_v34 }
  0x38   :  { %760 = vmatpush3.bf16.msra.mxu0 %v834_v42 }
  0x39   :  { %761 = vmatprep.subr.bf16.mxu0 %v845_v34 }
  0x3a   :  { %780 = vmatpush3.bf16.msra.mxu1 %v842_v50 }
  0x3b   :  { %781 = vmatprep.subr.bf16.mxu1 %v845_v34 }
  0x3c   :  { %762 = vmatpush3.bf16.msra.mxu0 %v835_v43 }
  0x3d   :  { %763 = vmatprep.subr.bf16.mxu0 %v845_v34 }
  0x3e   :  { %782 = vmatpush3.bf16.msra.mxu1 %v843_v7 }
  0x3f   :  { %783 = vmatprep.subr.bf16.mxu1 %v845_v34 }
  0x40   :  { %764 = vmatpush3.bf16.msra.mxu0 %v836_v44 }
  0x42   :  { %784 = vmatpush3.bf16.msra.mxu1 %v844_v8 }
  0xf6   :  { %v703_v51 = vpop.f32.mrb[0].mxu0 }
  0xf7   :  { %v725_v52 = vpop.f32.mrb[0].mxu1  ;;  %v704_v54 = vpop.f32.mrb[1].mxu0 }
  0xf8   :  { %v705_v55 = vadd.f32 %v704_v54, %v703_v51  ;;  %v726_v56 = vpop.f32.mrb[1].mxu1  ;;  %v706_v57 = vpop.f32.mrb[2].mxu0 }
  0xf9   :  { %v727_v58 = vadd.f32 %v726_v56, %v725_v52  ;;  %v728_v59 = vpop.f32.mrb[2].mxu1  ;;  %v707_v60 = vpop.f32.mrb[3].mxu0 }
  0xfa   :  { %v349_v61 = vadd.f32 %v705_v55, %v632_v53  ;;  %v708_v62 = vadd.f32 %v707_v60, %v706_v57  ;;  %v729_v63 = vpop.f32.mrb[3].mxu1 }
  0xfb   :  { %v730_v0 = vadd.f32 %v729_v63, %v728_v59 }
  0xfc   :  { %v390_v1 = vadd.f32 %v727_v58, %v349_v61  ;;  %v352_v2 = vadd.f32 %v708_v62, %v632_v53 }
  0xfe   :  { %v393_v3 = vadd.f32 %v730_v0, %v352_v2  ;;  %v396_v4 = vmax.f32 %v390_v1, 0.0 }
 0x100   :  { %v397_v5 = vmax.f32 %v393_v3, 0.0 }
 0x102   :  { %v398_v6 = vpack.c.bf16 %v397_v5, %v396_v4 }
 0x104   :  { %766 = vmatmul.mubr.bf16.vlgmr.msra.gmra.mrb[4].mxu0 %v398_v6 }
 0x1d7   :  { %v504_v10 = vpop.f32.mrb[4].mxu0 }
 0x1d8   :  { %v505_v11 = vadd.f32 %v669_v9, %v504_v10  ;;  %v767_v12 = vpop.f32.mrb[5].mxu0 }
 0x1d9   :  { %v507_v13 = vpop.f32.mrb[6].mxu0 }
 0x1da   :  { %v508_v14 = vadd.f32 %v669_v9, %v507_v13  ;;  %v768_v15 = vpop.f32.mrb[7].mxu0  ;;  %v511_v16 = vmax.f32 %v505_v11, 0.0 }
 0x1dc   :  { %v512_v17 = vmax.f32 %v508_v14, 0.0 }
 0x1de   :  { %v513_v18 = vpack.c.bf16 %v512_v17, %v511_v16 }
 0x1e0   :  { %786 = vmatmul.mubr.bf16.vlgmr.msra.gmra.mrb[4].mxu1 %v513_v18 }
 0x2b3   :  { %v619_v20 = vpop.f32.mrb[4].mxu1 }
 0x2b4   :  { %v620_v21 = vadd.f32 %v678_v19, %v619_v20  ;;  %v787_v22 = vpop.f32.mrb[5].mxu1 }
 0x2b5   :  { %v622_v23 = vpop.f32.mrb[6].mxu1 }
 0x2b6   :  { %626 = vst [vmem:[%s1083_s7] sm:$0xff] %v620_v21  ;;  %v623_v24 = vadd.f32 %v678_v19, %v622_v23  ;;  %v788_v25 = vpop.f32.mrb[7].mxu1 }
 0x2b8   :  { %627 = vst [vmem:[%s1083_s7 + $0x8] sm:$0xff] %v623_v24 }

</bundles_post_ra>
